<compile_context>
chip_gen: v6e
topology: v6e:2x2x1
jax: 0.10.0
libtpu: 0.0.40
codegen_flags: <defaults>
</compile_context>

<pallas_src>
import functools

import numpy as np
import jax
import jax.numpy as jnp
from jax import lax
from jax.experimental import pallas as pl
from jax.experimental.pallas import tpu as pltpu

START_TAG = '<START>'
STOP_TAG = '<PADDING>'
VERY_NEG_NUMBER = -1e+30


def _viterbi_block_kernel(feats_ref, trans_ref, back_ref, fv_ref, *,
                          start_idx, time_block, n_tags):
    """Process `time_block` Viterbi steps per grid iteration (batch-last layout).

    feats_ref : (TS, T, BB)  emission scores (rows past the sequence are unused)
    trans_ref : (T, T)       transitions[to, from]
    back_ref  : (TS, T, BB)  int32 back-pointers output (to-major, batch-last)
    fv_ref    : (T, BB)      f32 scratch, Viterbi scores indexed by 'from' tag,
                             carried across time blocks
    """
    ti = pl.program_id(1)                       # time-block axis (innermost)
    T = n_tags
    bb = fv_ref.shape[1]

    @pl.when(ti == 0)
    def _():
        row = lax.broadcasted_iota(jnp.int32, (T, bb), 0)
        fv_ref[...] = jnp.where(row == start_idx,
                                jnp.float32(0.0),
                                jnp.float32(VERY_NEG_NUMBER))

    trans = trans_ref[...]                      # (T, T)  trans[to, from]
    # Hoisted out of the time loop: per-'from' transition columns broadcast over
    # the batch lanes (JAX does not CSE broadcast_in_dim; keep it outside loops).
    t_cols = [jnp.broadcast_to(trans[:, f][:, None], (T, bb)) for f in range(T)]
    zero_id = jnp.zeros((T, bb), jnp.int32)

    def step(s, fv):
        # nv[to, f, b] = fv[f, b] + trans[to, f]; max/argmax over f unrolled as
        # compare/selects on (T, BB) vregs -> pure VALU work, lane-dense.
        # Strict '>' keeps the FIRST maximal index (np.argmax semantics).
        best = fv[0:1, :] + t_cols[0]           # sublane-broadcast of fv row 0
        best_id = zero_id
        for f in range(1, T):
            cand = fv[f:f + 1, :] + t_cols[f]
            take = cand > best
            best = jnp.where(take, cand, best)
            best_id = jnp.where(take, jnp.int32(f), best_id)
        back_ref[s] = best_id
        # Emission depends only on 'to' -> added AFTER the max (argmax unchanged).
        # feats may be bf16; accumulate the carry in f32.
        return best + feats_ref[s].astype(jnp.float32)

    fv_ref[...] = lax.fori_loop(0, time_block, step, fv_ref[...], unroll=True)


def viterbi_backpointers(feats, transitions, start_idx, *,
                         time_block=32, batch_block=None):
    """Run the Viterbi recurrence on TPU.

    feats: (seq, B, T).  Returns the raw (un-masked) back-pointer table of shape
    (seq+1, T, B) int32 (to-major, batch-last).
    """
    seq, B, T = feats.shape
    n_steps = seq + 1
    ts = max(1, min(time_block, seq))           # block never exceeds either array
    nb_t = pl.cdiv(n_steps, ts)
    feats_nb = pl.cdiv(seq, ts)                 # blocks containing real emissions

    if batch_block is None:
        # Keep lanes full (128) and give >=2 batch blocks for large B so the
        # "parallel" axis can shard across v7x's two TensorCores.
        bb = 128 if (B > 128 and B % 128 == 0) else B
    else:
        bb = batch_block
    assert bb == B or (B % bb == 0 and bb % 128 == 0), \
        "batch_block must equal B or be a multiple of 128 dividing B"
    nb_b = B // bb

    # One transpose in the wrapper puts batch on the lane axis for the kernel.
    feats_tb = jnp.transpose(feats, (0, 2, 1))            # (seq, T, B)
    trans = transitions.astype(jnp.float32)

    kernel = functools.partial(_viterbi_block_kernel, start_idx=start_idx,
                               time_block=ts, n_tags=T)

    # TODO(synk): int8/int16 back-pointers (4x less writeback) skipped: packed
    # dtypes with a tiny (T=8) second-minor dim risk Mosaic tiling edge cases.
    back = pl.pallas_call(
        kernel,
        out_shape=jax.ShapeDtypeStruct((n_steps, T, B), jnp.int32),
        grid_spec=pltpu.PrefetchScalarGridSpec(
            num_scalar_prefetch=0,
            grid=(nb_b, nb_t),                  # (batch blocks, time blocks)
            in_specs=[
                # Clamp the feats block for the tail time block (its steps are
                # either the transition-only step or dead block padding).
                pl.BlockSpec((ts, T, bb),
                             lambda bi, ti, _last=feats_nb - 1:
                             (jnp.minimum(ti, _last), 0, bi)),
                pl.BlockSpec((T, T), lambda bi, ti: (0, 0)),
            ],
            out_specs=pl.BlockSpec((ts, T, bb), lambda bi, ti: (ti, 0, bi)),
            scratch_shapes=[pltpu.VMEM((T, bb), jnp.float32)],
        ),
        # Tiles are tiny here; set vmem_limit_bytes if bb/ts/T are enlarged
        # (v5e's default scoped VMEM is only 16 MiB).
        compiler_params=pltpu.CompilerParams(
            dimension_semantics=("parallel", "arbitrary")),
    )(feats_tb, trans)
    return back


def _backtrack(back, mask, stop_idx):
    """Device back-tracking with the mask applied to the pointer stream.

    back: (seq+1, T, B) raw back-pointers; mask: (seq, B).  Returns (seq, B).
    Equivalent to masking the whole table then back-tracking (the mask is
    per-(step, batch), independent of the tag index being gathered).
    """
    seq_p1, T, B = back.shape
    seq = seq_p1 - 1
    stop = jnp.int32(stop_idx)
    mask_i = mask.astype(jnp.int32)

    p0 = jnp.where(mask_i[seq - 1] == 0, stop, back[seq, stop_idx, :])   # (B,)
    decode = jnp.zeros((seq, B), jnp.int32).at[seq - 1].set(p0)

    def body(i, carry):
        ptr, dec = carry
        t = seq - 1 - i                                    # t = seq-1 .. 1
        back_t = lax.dynamic_index_in_dim(back, t, axis=0, keepdims=False)   # (T,B)
        g = jnp.take_along_axis(back_t, ptr[None, :], axis=0)[0]             # (B,)
        m = lax.dynamic_index_in_dim(mask_i, t - 1, axis=0, keepdims=False)  # (B,)
        new = jnp.where(m == 0, stop, g)
        dec = lax.dynamic_update_index_in_dim(dec, new, t - 1, axis=0)
        return new, dec

    if seq > 1:
        _, decode = lax.fori_loop(0, seq - 1, body, (p0, decode))
    return decode


@functools.partial(jax.jit, static_argnames=("start_idx", "stop_idx",
                                             "time_block", "batch_block"))
def viterbi_decode_device(feats, transitions, mask, *, start_idx, stop_idx,
                          time_block=32, batch_block=None):
    """Full device-side Viterbi decode: returns (seq, B) int32 tag table."""
    back = viterbi_backpointers(feats, transitions, start_idx,
                                time_block=time_block, batch_block=batch_block)
    return _backtrack(back, mask, stop_idx)


class CRFPallas:
    """JAX/Pallas port of the PyTorch CRF module's forward pass (Viterbi decode)."""

    def __init__(self, config, tag_to_ix, hidden_dim):
        self.config = config
        self.tag_to_ix = tag_to_ix
        self.target_size = len(tag_to_ix)
        # nn.Parameter(randn(...)) followed by .data.zero_()  ->  zeros
        trans = np.zeros((self.target_size, self.target_size), np.float32)
        if config['transition']:
            trans[tag_to_ix[START_TAG], :] = VERY_NEG_NUMBER
            trans[:, tag_to_ix[STOP_TAG]] = VERY_NEG_NUMBER
        self.transitions = jnp.asarray(trans)
        # TODO(synk): _forward_alg / neg_log_likelihood (training loss) not ported;
        #             only the forward (Viterbi decode) path is implemented.
        # TODO(synk): config['large_crf']=True scoring branch (length-masked
        #             transitions) not implemented; the standard branch is used.

    def forward(self, sentence, mask, lengths):
        del lengths  # only used by the large_crf scoring branch
        seq, B, T = sentence.shape
        assert T == self.target_size
        start_idx = self.tag_to_ix[START_TAG]
        stop_idx = self.tag_to_ix[STOP_TAG]

        decode = viterbi_decode_device(sentence, self.transitions, mask,
                                       start_idx=start_idx, stop_idx=stop_idx)
        # Only the tiny (seq, B) int32 table crosses device->host.
        decode = np.asarray(jax.block_until_ready(decode))

        # remove_endtag: truncate each sequence at the first STOP tag (ragged, host).
        lst_decode = []
        for b in range(B):
            tags_b = []
            for tg in decode[:, b].tolist():
                if tg == stop_idx:
                    break
                tags_b.append(int(tg))
            lst_decode.append(tags_b)
        return lst_decode


def _reference_decode(feats, trans, mask, start_idx, stop_idx):
    """Pure numpy replication of the original PyTorch _viterbi_decode (test only)."""
    feats = np.asarray(feats, np.float32)
    trans = np.asarray(trans, np.float32)
    mask = np.asarray(mask, np.int32)
    seq, B, T = feats.shape
    scores = feats[:, :, :, None] + trans[None, None, :, :]          # (seq,B,T,T)
    scores_end = np.concatenate(
        [scores, np.broadcast_to(trans, (1, B, T, T))], axis=0)      # (seq+1,B,T,T)
    mask_end = np.concatenate([np.ones((1, B), np.int32), mask], axis=0)
    fv = np.full((B, T), VERY_NEG_NUMBER, np.float32)
    fv[:, start_idx] = 0.0
    back = []
    for idx in range(seq + 1):
        nv = (fv[:, None, :] + scores_end[idx]).astype(np.float32)
        best_id = np.argmax(nv, -1).astype(np.int32)
        fv = np.max(nv, -1).astype(np.float32)
        best_id = np.where(mask_end[idx][:, None] == 0, stop_idx, best_id)
        back.append(best_id)
    decode = np.zeros((seq, B), np.int64)
    pointer = back[-1][:, stop_idx]
    decode[-1] = pointer
    for idx in range(seq - 1, 0, -1):
        pointer = back[idx][np.arange(B), pointer]
        decode[idx - 1] = pointer
    out = []
    for b in range(B):
        tags = []
        for tg in decode[:, b].tolist():
            if tg == stop_idx:
                break
            tags.append(int(tg))
        out.append(tags)
    return out


if __name__ == "__main__":
    tags = ['O', 'B', 'I', 'E', 'S', 'X', START_TAG, STOP_TAG]
    tag_to_ix = {t: i for i, t in enumerate(tags)}
    config = {'transition': True, 'large_crf': False, 'USE_CUDA': False}
    hidden_dim = 32

    crf = CRFPallas(config, tag_to_ix, hidden_dim)

    seq_len, batch = 8, 2
    T = len(tags)
    key = jax.random.PRNGKey(0)
    sentence = jax.random.normal(key, (seq_len, batch, T), dtype=jnp.float32)

    lengths = [8, 5]
    mask_np = np.zeros((seq_len, batch), np.int32)
    for b, L in enumerate(lengths):
        mask_np[:L, b] = 1
    mask = jnp.asarray(mask_np)

    decoded = crf.forward(sentence, mask, lengths)
    assert len(decoded) == batch

    # Self-test against a numpy replication of the original PyTorch module
    # (kept out of the production forward() path).
    ref = _reference_decode(sentence, crf.transitions, mask_np,
                            tag_to_ix[START_TAG], tag_to_ix[STOP_TAG])
    assert decoded == ref, f"decode mismatch: {decoded} vs {ref}"

    print("KERNEL_OK")
</pallas_src>

<mosaic_0001>
module attributes {stable_mosaic.version = 11 : i64} {
  func.func @_viterbi_block_kernel(%arg0: i32, %arg1: i32, %arg2: memref<8x8x2xf32, #tpu.memory_space<vmem>>, %arg3: memref<8x8xf32, #tpu.memory_space<vmem>>, %arg4: memref<8x8x2xi32, #tpu.memory_space<vmem>>, %arg5: memref<8x2xf32, #tpu.memory_space<vmem>>) attributes {dimension_semantics = [#tpu.dimension_semantics<parallel>, #tpu.dimension_semantics<arbitrary>], iteration_bounds = array<i64: 1, 2>, scalar_prefetch = 0 : i64, scratch_operands = 1 : i64, tpu.core_type = #tpu.core_type<tc>, window_params = [{transform_indices = @transform_0, window_bounds = array<i64: 8, 8, 2>}, {pipeline_mode = #tpu.pipeline_mode<synchronous>, transform_indices = @transform_1, window_bounds = array<i64: 8, 8>}, {transform_indices = @transform_2, window_bounds = array<i64: 8, 8, 2>}]} {
    %c0_i32 = arith.constant 0 : i32
    %0 = arith.cmpi eq, %arg1, %c0_i32 : i32
    %1 = arith.extui %0 : i1 to i32
    %c0_i32_0 = arith.constant 0 : i32
    %2 = arith.cmpi ne, %1, %c0_i32_0 : i32
    scf.if %2 {
      %527 = tpu.iota {dimensions = array<i32: 0>} : vector<8x2xi32>
      %c6_i32_96 = arith.constant 6 : i32
      %528 = vector.broadcast %c6_i32_96 : i32 to vector<8x2xi32>
      %529 = arith.cmpi eq, %527, %528 : vector<8x2xi32>
      %cst = arith.constant 0.000000e+00 : f32
      %cst_97 = arith.constant -1.000000e+30 : f32
      %530 = vector.broadcast %cst : f32 to vector<8x2xf32>
      %531 = vector.broadcast %cst_97 : f32 to vector<8x2xf32>
      %532 = arith.select %529, %530, %531 : vector<8x2xi1>, vector<8x2xf32>
      %c0_98 = arith.constant 0 : index
      %c0_99 = arith.constant 0 : index
      %533 = vector.load %arg5[%c0_98, %c0_99] : memref<8x2xf32, #tpu.memory_space<vmem>>, vector<8x2xf32>
      tpu.vector_store %arg5[%c0_98, %c0_99], %532 {strides = array<i32>} : memref<8x2xf32, #tpu.memory_space<vmem>>, vector<8x2xf32>,
    } else {
    }
    %c0 = arith.constant 0 : index
    %c0_1 = arith.constant 0 : index
    %3 = vector.load %arg3[%c0, %c0_1] : memref<8x8xf32, #tpu.memory_space<vmem>>, vector<8x8xf32>
    %4 = vector.extract_strided_slice %3 {offsets = [0, 0], sizes = [8, 1], strides = [1, 1]} : vector<8x8xf32> to vector<8x1xf32>
    %5 = vector.shape_cast %4 : vector<8x1xf32> to vector<8xf32>
    %6 = vector.shape_cast %5 : vector<8xf32> to vector<8x1xf32>
    %7 = vector.shape_cast %6 : vector<8x1xf32> to vector<8x1xf32>
    %8 = vector.broadcast %7 : vector<8x1xf32> to vector<8x2xf32>
    %9 = vector.extract_strided_slice %3 {offsets = [0, 1], sizes = [8, 1], strides = [1, 1]} : vector<8x8xf32> to vector<8x1xf32>
    %10 = vector.shape_cast %9 : vector<8x1xf32> to vector<8xf32>
    %11 = vector.shape_cast %10 : vector<8xf32> to vector<8x1xf32>
    %12 = vector.shape_cast %11 : vector<8x1xf32> to vector<8x1xf32>
    %13 = vector.broadcast %12 : vector<8x1xf32> to vector<8x2xf32>
    %14 = vector.extract_strided_slice %3 {offsets = [0, 2], sizes = [8, 1], strides = [1, 1]} : vector<8x8xf32> to vector<8x1xf32>
    %15 = vector.shape_cast %14 : vector<8x1xf32> to vector<8xf32>
    %16 = vector.shape_cast %15 : vector<8xf32> to vector<8x1xf32>
    %17 = vector.shape_cast %16 : vector<8x1xf32> to vector<8x1xf32>
    %18 = vector.broadcast %17 : vector<8x1xf32> to vector<8x2xf32>
    %19 = vector.extract_strided_slice %3 {offsets = [0, 3], sizes = [8, 1], strides = [1, 1]} : vector<8x8xf32> to vector<8x1xf32>
    %20 = vector.shape_cast %19 : vector<8x1xf32> to vector<8xf32>
    %21 = vector.shape_cast %20 : vector<8xf32> to vector<8x1xf32>
    %22 = vector.shape_cast %21 : vector<8x1xf32> to vector<8x1xf32>
    %23 = vector.broadcast %22 : vector<8x1xf32> to vector<8x2xf32>
    %24 = vector.extract_strided_slice %3 {offsets = [0, 4], sizes = [8, 1], strides = [1, 1]} : vector<8x8xf32> to vector<8x1xf32>
    %25 = vector.shape_cast %24 : vector<8x1xf32> to vector<8xf32>
    %26 = vector.shape_cast %25 : vector<8xf32> to vector<8x1xf32>
    %27 = vector.shape_cast %26 : vector<8x1xf32> to vector<8x1xf32>
    %28 = vector.broadcast %27 : vector<8x1xf32> to vector<8x2xf32>
    %29 = vector.extract_strided_slice %3 {offsets = [0, 5], sizes = [8, 1], strides = [1, 1]} : vector<8x8xf32> to vector<8x1xf32>
    %30 = vector.shape_cast %29 : vector<8x1xf32> to vector<8xf32>
    %31 = vector.shape_cast %30 : vector<8xf32> to vector<8x1xf32>
    %32 = vector.shape_cast %31 : vector<8x1xf32> to vector<8x1xf32>
    %33 = vector.broadcast %32 : vector<8x1xf32> to vector<8x2xf32>
    %34 = vector.extract_strided_slice %3 {offsets = [0, 6], sizes = [8, 1], strides = [1, 1]} : vector<8x8xf32> to vector<8x1xf32>
    %35 = vector.shape_cast %34 : vector<8x1xf32> to vector<8xf32>
    %36 = vector.shape_cast %35 : vector<8xf32> to vector<8x1xf32>
    %37 = vector.shape_cast %36 : vector<8x1xf32> to vector<8x1xf32>
    %38 = vector.broadcast %37 : vector<8x1xf32> to vector<8x2xf32>
    %39 = vector.extract_strided_slice %3 {offsets = [0, 7], sizes = [8, 1], strides = [1, 1]} : vector<8x8xf32> to vector<8x1xf32>
    %40 = vector.shape_cast %39 : vector<8x1xf32> to vector<8xf32>
    %41 = vector.shape_cast %40 : vector<8xf32> to vector<8x1xf32>
    %42 = vector.shape_cast %41 : vector<8x1xf32> to vector<8x1xf32>
    %43 = vector.broadcast %42 : vector<8x1xf32> to vector<8x2xf32>
    %c0_i32_2 = arith.constant 0 : i32
    %44 = vector.broadcast %c0_i32_2 : i32 to vector<8x2xi32>
    %c0_3 = arith.constant 0 : index
    %c0_4 = arith.constant 0 : index
    %45 = vector.load %arg5[%c0_3, %c0_4] : memref<8x2xf32, #tpu.memory_space<vmem>>, vector<8x2xf32>
    %c0_i32_5 = arith.constant 0 : i32
    %46 = vector.extract_strided_slice %45 {offsets = [0, 0], sizes = [1, 2], strides = [1, 1]} : vector<8x2xf32> to vector<1x2xf32>
    %47 = vector.broadcast %46 : vector<1x2xf32> to vector<8x2xf32>
    %48 = arith.addf %47, %8 : vector<8x2xf32>
    %49 = vector.extract_strided_slice %45 {offsets = [1, 0], sizes = [1, 2], strides = [1, 1]} : vector<8x2xf32> to vector<1x2xf32>
    %50 = vector.broadcast %49 : vector<1x2xf32> to vector<8x2xf32>
    %51 = arith.addf %50, %13 : vector<8x2xf32>
    %52 = arith.cmpf ogt, %51, %48 : vector<8x2xf32>
    %53 = arith.select %52, %51, %48 : vector<8x2xi1>, vector<8x2xf32>
    %c1_i32 = arith.constant 1 : i32
    %54 = vector.broadcast %c1_i32 : i32 to vector<8x2xi32>
    %55 = arith.select %52, %54, %44 : vector<8x2xi1>, vector<8x2xi32>
    %56 = vector.extract_strided_slice %45 {offsets = [2, 0], sizes = [1, 2], strides = [1, 1]} : vector<8x2xf32> to vector<1x2xf32>
    %57 = vector.broadcast %56 : vector<1x2xf32> to vector<8x2xf32>
    %58 = arith.addf %57, %18 : vector<8x2xf32>
    %59 = arith.cmpf ogt, %58, %53 : vector<8x2xf32>
    %60 = arith.select %59, %58, %53 : vector<8x2xi1>, vector<8x2xf32>
    %c2_i32 = arith.constant 2 : i32
    %61 = vector.broadcast %c2_i32 : i32 to vector<8x2xi32>
    %62 = arith.select %59, %61, %55 : vector<8x2xi1>, vector<8x2xi32>
    %63 = vector.extract_strided_slice %45 {offsets = [3, 0], sizes = [1, 2], strides = [1, 1]} : vector<8x2xf32> to vector<1x2xf32>
    %64 = vector.broadcast %63 : vector<1x2xf32> to vector<8x2xf32>
    %65 = arith.addf %64, %23 : vector<8x2xf32>
    %66 = arith.cmpf ogt, %65, %60 : vector<8x2xf32>
    %67 = arith.select %66, %65, %60 : vector<8x2xi1>, vector<8x2xf32>
    %c3_i32 = arith.constant 3 : i32
    %68 = vector.broadcast %c3_i32 : i32 to vector<8x2xi32>
    %69 = arith.select %66, %68, %62 : vector<8x2xi1>, vector<8x2xi32>
    %70 = vector.extract_strided_slice %45 {offsets = [4, 0], sizes = [1, 2], strides = [1, 1]} : vector<8x2xf32> to vector<1x2xf32>
    %71 = vector.broadcast %70 : vector<1x2xf32> to vector<8x2xf32>
    %72 = arith.addf %71, %28 : vector<8x2xf32>
    %73 = arith.cmpf ogt, %72, %67 : vector<8x2xf32>
    %74 = arith.select %73, %72, %67 : vector<8x2xi1>, vector<8x2xf32>
    %c4_i32 = arith.constant 4 : i32
    %75 = vector.broadcast %c4_i32 : i32 to vector<8x2xi32>
    %76 = arith.select %73, %75, %69 : vector<8x2xi1>, vector<8x2xi32>
    %77 = vector.extract_strided_slice %45 {offsets = [5, 0], sizes = [1, 2], strides = [1, 1]} : vector<8x2xf32> to vector<1x2xf32>
    %78 = vector.broadcast %77 : vector<1x2xf32> to vector<8x2xf32>
    %79 = arith.addf %78, %33 : vector<8x2xf32>
    %80 = arith.cmpf ogt, %79, %74 : vector<8x2xf32>
    %81 = arith.select %80, %79, %74 : vector<8x2xi1>, vector<8x2xf32>
    %c5_i32 = arith.constant 5 : i32
    %82 = vector.broadcast %c5_i32 : i32 to vector<8x2xi32>
    %83 = arith.select %80, %82, %76 : vector<8x2xi1>, vector<8x2xi32>
    %84 = vector.extract_strided_slice %45 {offsets = [6, 0], sizes = [1, 2], strides = [1, 1]} : vector<8x2xf32> to vector<1x2xf32>
    %85 = vector.broadcast %84 : vector<1x2xf32> to vector<8x2xf32>
    %86 = arith.addf %85, %38 : vector<8x2xf32>
    %87 = arith.cmpf ogt, %86, %81 : vector<8x2xf32>
    %88 = arith.select %87, %86, %81 : vector<8x2xi1>, vector<8x2xf32>
    %c6_i32 = arith.constant 6 : i32
    %89 = vector.broadcast %c6_i32 : i32 to vector<8x2xi32>
    %90 = arith.select %87, %89, %83 : vector<8x2xi1>, vector<8x2xi32>
    %91 = vector.extract_strided_slice %45 {offsets = [7, 0], sizes = [1, 2], strides = [1, 1]} : vector<8x2xf32> to vector<1x2xf32>
    %92 = vector.broadcast %91 : vector<1x2xf32> to vector<8x2xf32>
    %93 = arith.addf %92, %43 : vector<8x2xf32>
    %94 = arith.cmpf ogt, %93, %88 : vector<8x2xf32>
    %95 = arith.select %94, %93, %88 : vector<8x2xi1>, vector<8x2xf32>
    %c7_i32 = arith.constant 7 : i32
    %96 = vector.broadcast %c7_i32 : i32 to vector<8x2xi32>
    %97 = arith.select %94, %96, %90 : vector<8x2xi1>, vector<8x2xi32>
    %98 = arith.index_cast %c0_i32_5 : i32 to index
    %c0_6 = arith.constant 0 : index
    %c0_7 = arith.constant 0 : index
    %99 = vector.load %arg4[%98, %c0_6, %c0_7] : memref<8x8x2xi32, #tpu.memory_space<vmem>>, vector<1x8x2xi32>
    %100 = vector.shape_cast %99 : vector<1x8x2xi32> to vector<8x2xi32>
    %101 = vector.shape_cast %97 : vector<8x2xi32> to vector<1x8x2xi32>
    tpu.vector_store %arg4[%98, %c0_6, %c0_7], %101 {strides = array<i32>} : memref<8x8x2xi32, #tpu.memory_space<vmem>>, vector<1x8x2xi32>,
    %102 = arith.index_cast %c0_i32_5 : i32 to index
    %c0_8 = arith.constant 0 : index
    %c0_9 = arith.constant 0 : index
    %103 = vector.load %arg2[%102, %c0_8, %c0_9] : memref<8x8x2xf32, #tpu.memory_space<vmem>>, vector<1x8x2xf32>
    %104 = vector.shape_cast %103 : vector<1x8x2xf32> to vector<8x2xf32>
    %105 = arith.addf %95, %104 : vector<8x2xf32>
    %c1_i32_10 = arith.constant 1 : i32
    %106 = vector.extract_strided_slice %105 {offsets = [0, 0], sizes = [1, 2], strides = [1, 1]} : vector<8x2xf32> to vector<1x2xf32>
    %107 = vector.broadcast %106 : vector<1x2xf32> to vector<8x2xf32>
    %108 = arith.addf %107, %8 : vector<8x2xf32>
    %109 = vector.extract_strided_slice %105 {offsets = [1, 0], sizes = [1, 2], strides = [1, 1]} : vector<8x2xf32> to vector<1x2xf32>
    %110 = vector.broadcast %109 : vector<1x2xf32> to vector<8x2xf32>
    %111 = arith.addf %110, %13 : vector<8x2xf32>
    %112 = arith.cmpf ogt, %111, %108 : vector<8x2xf32>
    %113 = arith.select %112, %111, %108 : vector<8x2xi1>, vector<8x2xf32>
    %c1_i32_11 = arith.constant 1 : i32
    %114 = vector.broadcast %c1_i32_11 : i32 to vector<8x2xi32>
    %115 = arith.select %112, %114, %44 : vector<8x2xi1>, vector<8x2xi32>
    %116 = vector.extract_strided_slice %105 {offsets = [2, 0], sizes = [1, 2], strides = [1, 1]} : vector<8x2xf32> to vector<1x2xf32>
    %117 = vector.broadcast %116 : vector<1x2xf32> to vector<8x2xf32>
    %118 = arith.addf %117, %18 : vector<8x2xf32>
    %119 = arith.cmpf ogt, %118, %113 : vector<8x2xf32>
    %120 = arith.select %119, %118, %113 : vector<8x2xi1>, vector<8x2xf32>
    %c2_i32_12 = arith.constant 2 : i32
    %121 = vector.broadcast %c2_i32_12 : i32 to vector<8x2xi32>
    %122 = arith.select %119, %121, %115 : vector<8x2xi1>, vector<8x2xi32>
    %123 = vector.extract_strided_slice %105 {offsets = [3, 0], sizes = [1, 2], strides = [1, 1]} : vector<8x2xf32> to vector<1x2xf32>
    %124 = vector.broadcast %123 : vector<1x2xf32> to vector<8x2xf32>
    %125 = arith.addf %124, %23 : vector<8x2xf32>
    %126 = arith.cmpf ogt, %125, %120 : vector<8x2xf32>
    %127 = arith.select %126, %125, %120 : vector<8x2xi1>, vector<8x2xf32>
    %c3_i32_13 = arith.constant 3 : i32
    %128 = vector.broadcast %c3_i32_13 : i32 to vector<8x2xi32>
    %129 = arith.select %126, %128, %122 : vector<8x2xi1>, vector<8x2xi32>
    %130 = vector.extract_strided_slice %105 {offsets = [4, 0], sizes = [1, 2], strides = [1, 1]} : vector<8x2xf32> to vector<1x2xf32>
    %131 = vector.broadcast %130 : vector<1x2xf32> to vector<8x2xf32>
    %132 = arith.addf %131, %28 : vector<8x2xf32>
    %133 = arith.cmpf ogt, %132, %127 : vector<8x2xf32>
    %134 = arith.select %133, %132, %127 : vector<8x2xi1>, vector<8x2xf32>
    %c4_i32_14 = arith.constant 4 : i32
    %135 = vector.broadcast %c4_i32_14 : i32 to vector<8x2xi32>
    %136 = arith.select %133, %135, %129 : vector<8x2xi1>, vector<8x2xi32>
    %137 = vector.extract_strided_slice %105 {offsets = [5, 0], sizes = [1, 2], strides = [1, 1]} : vector<8x2xf32> to vector<1x2xf32>
    %138 = vector.broadcast %137 : vector<1x2xf32> to vector<8x2xf32>
    %139 = arith.addf %138, %33 : vector<8x2xf32>
    %140 = arith.cmpf ogt, %139, %134 : vector<8x2xf32>
    %141 = arith.select %140, %139, %134 : vector<8x2xi1>, vector<8x2xf32>
    %c5_i32_15 = arith.constant 5 : i32
    %142 = vector.broadcast %c5_i32_15 : i32 to vector<8x2xi32>
    %143 = arith.select %140, %142, %136 : vector<8x2xi1>, vector<8x2xi32>
    %144 = vector.extract_strided_slice %105 {offsets = [6, 0], sizes = [1, 2], strides = [1, 1]} : vector<8x2xf32> to vector<1x2xf32>
    %145 = vector.broadcast %144 : vector<1x2xf32> to vector<8x2xf32>
    %146 = arith.addf %145, %38 : vector<8x2xf32>
    %147 = arith.cmpf ogt, %146, %141 : vector<8x2xf32>
    %148 = arith.select %147, %146, %141 : vector<8x2xi1>, vector<8x2xf32>
    %c6_i32_16 = arith.constant 6 : i32
    %149 = vector.broadcast %c6_i32_16 : i32 to vector<8x2xi32>
    %150 = arith.select %147, %149, %143 : vector<8x2xi1>, vector<8x2xi32>
    %151 = vector.extract_strided_slice %105 {offsets = [7, 0], sizes = [1, 2], strides = [1, 1]} : vector<8x2xf32> to vector<1x2xf32>
    %152 = vector.broadcast %151 : vector<1x2xf32> to vector<8x2xf32>
    %153 = arith.addf %152, %43 : vector<8x2xf32>
    %154 = arith.cmpf ogt, %153, %148 : vector<8x2xf32>
    %155 = arith.select %154, %153, %148 : vector<8x2xi1>, vector<8x2xf32>
    %c7_i32_17 = arith.constant 7 : i32
    %156 = vector.broadcast %c7_i32_17 : i32 to vector<8x2xi32>
    %157 = arith.select %154, %156, %150 : vector<8x2xi1>, vector<8x2xi32>
    %158 = arith.index_cast %c1_i32_10 : i32 to index
    %c0_18 = arith.constant 0 : index
    %c0_19 = arith.constant 0 : index
    %159 = vector.load %arg4[%158, %c0_18, %c0_19] : memref<8x8x2xi32, #tpu.memory_space<vmem>>, vector<1x8x2xi32>
    %160 = vector.shape_cast %159 : vector<1x8x2xi32> to vector<8x2xi32>
    %161 = vector.shape_cast %157 : vector<8x2xi32> to vector<1x8x2xi32>
    tpu.vector_store %arg4[%158, %c0_18, %c0_19], %161 {strides = array<i32>} : memref<8x8x2xi32, #tpu.memory_space<vmem>>, vector<1x8x2xi32>,
    %162 = arith.index_cast %c1_i32_10 : i32 to index
    %c0_20 = arith.constant 0 : index
    %c0_21 = arith.constant 0 : index
    %163 = vector.load %arg2[%162, %c0_20, %c0_21] : memref<8x8x2xf32, #tpu.memory_space<vmem>>, vector<1x8x2xf32>
    %164 = vector.shape_cast %163 : vector<1x8x2xf32> to vector<8x2xf32>
    %165 = arith.addf %155, %164 : vector<8x2xf32>
    %c2_i32_22 = arith.constant 2 : i32
    %166 = vector.extract_strided_slice %165 {offsets = [0, 0], sizes = [1, 2], strides = [1, 1]} : vector<8x2xf32> to vector<1x2xf32>
    %167 = vector.broadcast %166 : vector<1x2xf32> to vector<8x2xf32>
    %168 = arith.addf %167, %8 : vector<8x2xf32>
    %169 = vector.extract_strided_slice %165 {offsets = [1, 0], sizes = [1, 2], strides = [1, 1]} : vector<8x2xf32> to vector<1x2xf32>
    %170 = vector.broadcast %169 : vector<1x2xf32> to vector<8x2xf32>
    %171 = arith.addf %170, %13 : vector<8x2xf32>
    %172 = arith.cmpf ogt, %171, %168 : vector<8x2xf32>
    %173 = arith.select %172, %171, %168 : vector<8x2xi1>, vector<8x2xf32>
    %c1_i32_23 = arith.constant 1 : i32
    %174 = vector.broadcast %c1_i32_23 : i32 to vector<8x2xi32>
    %175 = arith.select %172, %174, %44 : vector<8x2xi1>, vector<8x2xi32>
    %176 = vector.extract_strided_slice %165 {offsets = [2, 0], sizes = [1, 2], strides = [1, 1]} : vector<8x2xf32> to vector<1x2xf32>
    %177 = vector.broadcast %176 : vector<1x2xf32> to vector<8x2xf32>
    %178 = arith.addf %177, %18 : vector<8x2xf32>
    %179 = arith.cmpf ogt, %178, %173 : vector<8x2xf32>
    %180 = arith.select %179, %178, %173 : vector<8x2xi1>, vector<8x2xf32>
    %c2_i32_24 = arith.constant 2 : i32
    %181 = vector.broadcast %c2_i32_24 : i32 to vector<8x2xi32>
    %182 = arith.select %179, %181, %175 : vector<8x2xi1>, vector<8x2xi32>
    %183 = vector.extract_strided_slice %165 {offsets = [3, 0], sizes = [1, 2], strides = [1, 1]} : vector<8x2xf32> to vector<1x2xf32>
    %184 = vector.broadcast %183 : vector<1x2xf32> to vector<8x2xf32>
    %185 = arith.addf %184, %23 : vector<8x2xf32>
    %186 = arith.cmpf ogt, %185, %180 : vector<8x2xf32>
    %187 = arith.select %186, %185, %180 : vector<8x2xi1>, vector<8x2xf32>
    %c3_i32_25 = arith.constant 3 : i32
    %188 = vector.broadcast %c3_i32_25 : i32 to vector<8x2xi32>
    %189 = arith.select %186, %188, %182 : vector<8x2xi1>, vector<8x2xi32>
    %190 = vector.extract_strided_slice %165 {offsets = [4, 0], sizes = [1, 2], strides = [1, 1]} : vector<8x2xf32> to vector<1x2xf32>
    %191 = vector.broadcast %190 : vector<1x2xf32> to vector<8x2xf32>
    %192 = arith.addf %191, %28 : vector<8x2xf32>
    %193 = arith.cmpf ogt, %192, %187 : vector<8x2xf32>
    %194 = arith.select %193, %192, %187 : vector<8x2xi1>, vector<8x2xf32>
    %c4_i32_26 = arith.constant 4 : i32
    %195 = vector.broadcast %c4_i32_26 : i32 to vector<8x2xi32>
    %196 = arith.select %193, %195, %189 : vector<8x2xi1>, vector<8x2xi32>
    %197 = vector.extract_strided_slice %165 {offsets = [5, 0], sizes = [1, 2], strides = [1, 1]} : vector<8x2xf32> to vector<1x2xf32>
    %198 = vector.broadcast %197 : vector<1x2xf32> to vector<8x2xf32>
    %199 = arith.addf %198, %33 : vector<8x2xf32>
    %200 = arith.cmpf ogt, %199, %194 : vector<8x2xf32>
    %201 = arith.select %200, %199, %194 : vector<8x2xi1>, vector<8x2xf32>
    %c5_i32_27 = arith.constant 5 : i32
    %202 = vector.broadcast %c5_i32_27 : i32 to vector<8x2xi32>
    %203 = arith.select %200, %202, %196 : vector<8x2xi1>, vector<8x2xi32>
    %204 = vector.extract_strided_slice %165 {offsets = [6, 0], sizes = [1, 2], strides = [1, 1]} : vector<8x2xf32> to vector<1x2xf32>
    %205 = vector.broadcast %204 : vector<1x2xf32> to vector<8x2xf32>
    %206 = arith.addf %205, %38 : vector<8x2xf32>
    %207 = arith.cmpf ogt, %206, %201 : vector<8x2xf32>
    %208 = arith.select %207, %206, %201 : vector<8x2xi1>, vector<8x2xf32>
    %c6_i32_28 = arith.constant 6 : i32
    %209 = vector.broadcast %c6_i32_28 : i32 to vector<8x2xi32>
    %210 = arith.select %207, %209, %203 : vector<8x2xi1>, vector<8x2xi32>
    %211 = vector.extract_strided_slice %165 {offsets = [7, 0], sizes = [1, 2], strides = [1, 1]} : vector<8x2xf32> to vector<1x2xf32>
    %212 = vector.broadcast %211 : vector<1x2xf32> to vector<8x2xf32>
    %213 = arith.addf %212, %43 : vector<8x2xf32>
    %214 = arith.cmpf ogt, %213, %208 : vector<8x2xf32>
    %215 = arith.select %214, %213, %208 : vector<8x2xi1>, vector<8x2xf32>
    %c7_i32_29 = arith.constant 7 : i32
    %216 = vector.broadcast %c7_i32_29 : i32 to vector<8x2xi32>
    %217 = arith.select %214, %216, %210 : vector<8x2xi1>, vector<8x2xi32>
    %218 = arith.index_cast %c2_i32_22 : i32 to index
    %c0_30 = arith.constant 0 : index
    %c0_31 = arith.constant 0 : index
    %219 = vector.load %arg4[%218, %c0_30, %c0_31] : memref<8x8x2xi32, #tpu.memory_space<vmem>>, vector<1x8x2xi32>
    %220 = vector.shape_cast %219 : vector<1x8x2xi32> to vector<8x2xi32>
    %221 = vector.shape_cast %217 : vector<8x2xi32> to vector<1x8x2xi32>
    tpu.vector_store %arg4[%218, %c0_30, %c0_31], %221 {strides = array<i32>} : memref<8x8x2xi32, #tpu.memory_space<vmem>>, vector<1x8x2xi32>,
    %222 = arith.index_cast %c2_i32_22 : i32 to index
    %c0_32 = arith.constant 0 : index
    %c0_33 = arith.constant 0 : index
    %223 = vector.load %arg2[%222, %c0_32, %c0_33] : memref<8x8x2xf32, #tpu.memory_space<vmem>>, vector<1x8x2xf32>
    %224 = vector.shape_cast %223 : vector<1x8x2xf32> to vector<8x2xf32>
    %225 = arith.addf %215, %224 : vector<8x2xf32>
    %c3_i32_34 = arith.constant 3 : i32
    %226 = vector.extract_strided_slice %225 {offsets = [0, 0], sizes = [1, 2], strides = [1, 1]} : vector<8x2xf32> to vector<1x2xf32>
    %227 = vector.broadcast %226 : vector<1x2xf32> to vector<8x2xf32>
    %228 = arith.addf %227, %8 : vector<8x2xf32>
    %229 = vector.extract_strided_slice %225 {offsets = [1, 0], sizes = [1, 2], strides = [1, 1]} : vector<8x2xf32> to vector<1x2xf32>
    %230 = vector.broadcast %229 : vector<1x2xf32> to vector<8x2xf32>
    %231 = arith.addf %230, %13 : vector<8x2xf32>
    %232 = arith.cmpf ogt, %231, %228 : vector<8x2xf32>
    %233 = arith.select %232, %231, %228 : vector<8x2xi1>, vector<8x2xf32>
    %c1_i32_35 = arith.constant 1 : i32
    %234 = vector.broadcast %c1_i32_35 : i32 to vector<8x2xi32>
    %235 = arith.select %232, %234, %44 : vector<8x2xi1>, vector<8x2xi32>
    %236 = vector.extract_strided_slice %225 {offsets = [2, 0], sizes = [1, 2], strides = [1, 1]} : vector<8x2xf32> to vector<1x2xf32>
    %237 = vector.broadcast %236 : vector<1x2xf32> to vector<8x2xf32>
    %238 = arith.addf %237, %18 : vector<8x2xf32>
    %239 = arith.cmpf ogt, %238, %233 : vector<8x2xf32>
    %240 = arith.select %239, %238, %233 : vector<8x2xi1>, vector<8x2xf32>
    %c2_i32_36 = arith.constant 2 : i32
    %241 = vector.broadcast %c2_i32_36 : i32 to vector<8x2xi32>
    %242 = arith.select %239, %241, %235 : vector<8x2xi1>, vector<8x2xi32>
    %243 = vector.extract_strided_slice %225 {offsets = [3, 0], sizes = [1, 2], strides = [1, 1]} : vector<8x2xf32> to vector<1x2xf32>
    %244 = vector.broadcast %243 : vector<1x2xf32> to vector<8x2xf32>
    %245 = arith.addf %244, %23 : vector<8x2xf32>
    %246 = arith.cmpf ogt, %245, %240 : vector<8x2xf32>
    %247 = arith.select %246, %245, %240 : vector<8x2xi1>, vector<8x2xf32>
    %c3_i32_37 = arith.constant 3 : i32
    %248 = vector.broadcast %c3_i32_37 : i32 to vector<8x2xi32>
    %249 = arith.select %246, %248, %242 : vector<8x2xi1>, vector<8x2xi32>
    %250 = vector.extract_strided_slice %225 {offsets = [4, 0], sizes = [1, 2], strides = [1, 1]} : vector<8x2xf32> to vector<1x2xf32>
    %251 = vector.broadcast %250 : vector<1x2xf32> to vector<8x2xf32>
    %252 = arith.addf %251, %28 : vector<8x2xf32>
    %253 = arith.cmpf ogt, %252, %247 : vector<8x2xf32>
    %254 = arith.select %253, %252, %247 : vector<8x2xi1>, vector<8x2xf32>
    %c4_i32_38 = arith.constant 4 : i32
    %255 = vector.broadcast %c4_i32_38 : i32 to vector<8x2xi32>
    %256 = arith.select %253, %255, %249 : vector<8x2xi1>, vector<8x2xi32>
    %257 = vector.extract_strided_slice %225 {offsets = [5, 0], sizes = [1, 2], strides = [1, 1]} : vector<8x2xf32> to vector<1x2xf32>
    %258 = vector.broadcast %257 : vector<1x2xf32> to vector<8x2xf32>
    %259 = arith.addf %258, %33 : vector<8x2xf32>
    %260 = arith.cmpf ogt, %259, %254 : vector<8x2xf32>
    %261 = arith.select %260, %259, %254 : vector<8x2xi1>, vector<8x2xf32>
    %c5_i32_39 = arith.constant 5 : i32
    %262 = vector.broadcast %c5_i32_39 : i32 to vector<8x2xi32>
    %263 = arith.select %260, %262, %256 : vector<8x2xi1>, vector<8x2xi32>
    %264 = vector.extract_strided_slice %225 {offsets = [6, 0], sizes = [1, 2], strides = [1, 1]} : vector<8x2xf32> to vector<1x2xf32>
    %265 = vector.broadcast %264 : vector<1x2xf32> to vector<8x2xf32>
    %266 = arith.addf %265, %38 : vector<8x2xf32>
    %267 = arith.cmpf ogt, %266, %261 : vector<8x2xf32>
    %268 = arith.select %267, %266, %261 : vector<8x2xi1>, vector<8x2xf32>
    %c6_i32_40 = arith.constant 6 : i32
    %269 = vector.broadcast %c6_i32_40 : i32 to vector<8x2xi32>
    %270 = arith.select %267, %269, %263 : vector<8x2xi1>, vector<8x2xi32>
    %271 = vector.extract_strided_slice %225 {offsets = [7, 0], sizes = [1, 2], strides = [1, 1]} : vector<8x2xf32> to vector<1x2xf32>
    %272 = vector.broadcast %271 : vector<1x2xf32> to vector<8x2xf32>
    %273 = arith.addf %272, %43 : vector<8x2xf32>
    %274 = arith.cmpf ogt, %273, %268 : vector<8x2xf32>
    %275 = arith.select %274, %273, %268 : vector<8x2xi1>, vector<8x2xf32>
    %c7_i32_41 = arith.constant 7 : i32
    %276 = vector.broadcast %c7_i32_41 : i32 to vector<8x2xi32>
    %277 = arith.select %274, %276, %270 : vector<8x2xi1>, vector<8x2xi32>
    %278 = arith.index_cast %c3_i32_34 : i32 to index
    %c0_42 = arith.constant 0 : index
    %c0_43 = arith.constant 0 : index
    %279 = vector.load %arg4[%278, %c0_42, %c0_43] : memref<8x8x2xi32, #tpu.memory_space<vmem>>, vector<1x8x2xi32>
    %280 = vector.shape_cast %279 : vector<1x8x2xi32> to vector<8x2xi32>
    %281 = vector.shape_cast %277 : vector<8x2xi32> to vector<1x8x2xi32>
    tpu.vector_store %arg4[%278, %c0_42, %c0_43], %281 {strides = array<i32>} : memref<8x8x2xi32, #tpu.memory_space<vmem>>, vector<1x8x2xi32>,
    %282 = arith.index_cast %c3_i32_34 : i32 to index
    %c0_44 = arith.constant 0 : index
    %c0_45 = arith.constant 0 : index
    %283 = vector.load %arg2[%282, %c0_44, %c0_45] : memref<8x8x2xf32, #tpu.memory_space<vmem>>, vector<1x8x2xf32>
    %284 = vector.shape_cast %283 : vector<1x8x2xf32> to vector<8x2xf32>
    %285 = arith.addf %275, %284 : vector<8x2xf32>
    %c4_i32_46 = arith.constant 4 : i32
    %286 = vector.extract_strided_slice %285 {offsets = [0, 0], sizes = [1, 2], strides = [1, 1]} : vector<8x2xf32> to vector<1x2xf32>
    %287 = vector.broadcast %286 : vector<1x2xf32> to vector<8x2xf32>
    %288 = arith.addf %287, %8 : vector<8x2xf32>
    %289 = vector.extract_strided_slice %285 {offsets = [1, 0], sizes = [1, 2], strides = [1, 1]} : vector<8x2xf32> to vector<1x2xf32>
    %290 = vector.broadcast %289 : vector<1x2xf32> to vector<8x2xf32>
    %291 = arith.addf %290, %13 : vector<8x2xf32>
    %292 = arith.cmpf ogt, %291, %288 : vector<8x2xf32>
    %293 = arith.select %292, %291, %288 : vector<8x2xi1>, vector<8x2xf32>
    %c1_i32_47 = arith.constant 1 : i32
    %294 = vector.broadcast %c1_i32_47 : i32 to vector<8x2xi32>
    %295 = arith.select %292, %294, %44 : vector<8x2xi1>, vector<8x2xi32>
    %296 = vector.extract_strided_slice %285 {offsets = [2, 0], sizes = [1, 2], strides = [1, 1]} : vector<8x2xf32> to vector<1x2xf32>
    %297 = vector.broadcast %296 : vector<1x2xf32> to vector<8x2xf32>
    %298 = arith.addf %297, %18 : vector<8x2xf32>
    %299 = arith.cmpf ogt, %298, %293 : vector<8x2xf32>
    %300 = arith.select %299, %298, %293 : vector<8x2xi1>, vector<8x2xf32>
    %c2_i32_48 = arith.constant 2 : i32
    %301 = vector.broadcast %c2_i32_48 : i32 to vector<8x2xi32>
    %302 = arith.select %299, %301, %295 : vector<8x2xi1>, vector<8x2xi32>
    %303 = vector.extract_strided_slice %285 {offsets = [3, 0], sizes = [1, 2], strides = [1, 1]} : vector<8x2xf32> to vector<1x2xf32>
    %304 = vector.broadcast %303 : vector<1x2xf32> to vector<8x2xf32>
    %305 = arith.addf %304, %23 : vector<8x2xf32>
    %306 = arith.cmpf ogt, %305, %300 : vector<8x2xf32>
    %307 = arith.select %306, %305, %300 : vector<8x2xi1>, vector<8x2xf32>
    %c3_i32_49 = arith.constant 3 : i32
    %308 = vector.broadcast %c3_i32_49 : i32 to vector<8x2xi32>
    %309 = arith.select %306, %308, %302 : vector<8x2xi1>, vector<8x2xi32>
    %310 = vector.extract_strided_slice %285 {offsets = [4, 0], sizes = [1, 2], strides = [1, 1]} : vector<8x2xf32> to vector<1x2xf32>
    %311 = vector.broadcast %310 : vector<1x2xf32> to vector<8x2xf32>
    %312 = arith.addf %311, %28 : vector<8x2xf32>
    %313 = arith.cmpf ogt, %312, %307 : vector<8x2xf32>
    %314 = arith.select %313, %312, %307 : vector<8x2xi1>, vector<8x2xf32>
    %c4_i32_50 = arith.constant 4 : i32
    %315 = vector.broadcast %c4_i32_50 : i32 to vector<8x2xi32>
    %316 = arith.select %313, %315, %309 : vector<8x2xi1>, vector<8x2xi32>
    %317 = vector.extract_strided_slice %285 {offsets = [5, 0], sizes = [1, 2], strides = [1, 1]} : vector<8x2xf32> to vector<1x2xf32>
    %318 = vector.broadcast %317 : vector<1x2xf32> to vector<8x2xf32>
    %319 = arith.addf %318, %33 : vector<8x2xf32>
    %320 = arith.cmpf ogt, %319, %314 : vector<8x2xf32>
    %321 = arith.select %320, %319, %314 : vector<8x2xi1>, vector<8x2xf32>
    %c5_i32_51 = arith.constant 5 : i32
    %322 = vector.broadcast %c5_i32_51 : i32 to vector<8x2xi32>
    %323 = arith.select %320, %322, %316 : vector<8x2xi1>, vector<8x2xi32>
    %324 = vector.extract_strided_slice %285 {offsets = [6, 0], sizes = [1, 2], strides = [1, 1]} : vector<8x2xf32> to vector<1x2xf32>
    %325 = vector.broadcast %324 : vector<1x2xf32> to vector<8x2xf32>
    %326 = arith.addf %325, %38 : vector<8x2xf32>
    %327 = arith.cmpf ogt, %326, %321 : vector<8x2xf32>
    %328 = arith.select %327, %326, %321 : vector<8x2xi1>, vector<8x2xf32>
    %c6_i32_52 = arith.constant 6 : i32
    %329 = vector.broadcast %c6_i32_52 : i32 to vector<8x2xi32>
    %330 = arith.select %327, %329, %323 : vector<8x2xi1>, vector<8x2xi32>
    %331 = vector.extract_strided_slice %285 {offsets = [7, 0], sizes = [1, 2], strides = [1, 1]} : vector<8x2xf32> to vector<1x2xf32>
    %332 = vector.broadcast %331 : vector<1x2xf32> to vector<8x2xf32>
    %333 = arith.addf %332, %43 : vector<8x2xf32>
    %334 = arith.cmpf ogt, %333, %328 : vector<8x2xf32>
    %335 = arith.select %334, %333, %328 : vector<8x2xi1>, vector<8x2xf32>
    %c7_i32_53 = arith.constant 7 : i32
    %336 = vector.broadcast %c7_i32_53 : i32 to vector<8x2xi32>
    %337 = arith.select %334, %336, %330 : vector<8x2xi1>, vector<8x2xi32>
    %338 = arith.index_cast %c4_i32_46 : i32 to index
    %c0_54 = arith.constant 0 : index
    %c0_55 = arith.constant 0 : index
    %339 = vector.load %arg4[%338, %c0_54, %c0_55] : memref<8x8x2xi32, #tpu.memory_space<vmem>>, vector<1x8x2xi32>
    %340 = vector.shape_cast %339 : vector<1x8x2xi32> to vector<8x2xi32>
    %341 = vector.shape_cast %337 : vector<8x2xi32> to vector<1x8x2xi32>
    tpu.vector_store %arg4[%338, %c0_54, %c0_55], %341 {strides = array<i32>} : memref<8x8x2xi32, #tpu.memory_space<vmem>>, vector<1x8x2xi32>,
    %342 = arith.index_cast %c4_i32_46 : i32 to index
    %c0_56 = arith.constant 0 : index
    %c0_57 = arith.constant 0 : index
    %343 = vector.load %arg2[%342, %c0_56, %c0_57] : memref<8x8x2xf32, #tpu.memory_space<vmem>>, vector<1x8x2xf32>
    %344 = vector.shape_cast %343 : vector<1x8x2xf32> to vector<8x2xf32>
    %345 = arith.addf %335, %344 : vector<8x2xf32>
    %c5_i32_58 = arith.constant 5 : i32
    %346 = vector.extract_strided_slice %345 {offsets = [0, 0], sizes = [1, 2], strides = [1, 1]} : vector<8x2xf32> to vector<1x2xf32>
    %347 = vector.broadcast %346 : vector<1x2xf32> to vector<8x2xf32>
    %348 = arith.addf %347, %8 : vector<8x2xf32>
    %349 = vector.extract_strided_slice %345 {offsets = [1, 0], sizes = [1, 2], strides = [1, 1]} : vector<8x2xf32> to vector<1x2xf32>
    %350 = vector.broadcast %349 : vector<1x2xf32> to vector<8x2xf32>
    %351 = arith.addf %350, %13 : vector<8x2xf32>
    %352 = arith.cmpf ogt, %351, %348 : vector<8x2xf32>
    %353 = arith.select %352, %351, %348 : vector<8x2xi1>, vector<8x2xf32>
    %c1_i32_59 = arith.constant 1 : i32
    %354 = vector.broadcast %c1_i32_59 : i32 to vector<8x2xi32>
    %355 = arith.select %352, %354, %44 : vector<8x2xi1>, vector<8x2xi32>
    %356 = vector.extract_strided_slice %345 {offsets = [2, 0], sizes = [1, 2], strides = [1, 1]} : vector<8x2xf32> to vector<1x2xf32>
    %357 = vector.broadcast %356 : vector<1x2xf32> to vector<8x2xf32>
    %358 = arith.addf %357, %18 : vector<8x2xf32>
    %359 = arith.cmpf ogt, %358, %353 : vector<8x2xf32>
    %360 = arith.select %359, %358, %353 : vector<8x2xi1>, vector<8x2xf32>
    %c2_i32_60 = arith.constant 2 : i32
    %361 = vector.broadcast %c2_i32_60 : i32 to vector<8x2xi32>
    %362 = arith.select %359, %361, %355 : vector<8x2xi1>, vector<8x2xi32>
    %363 = vector.extract_strided_slice %345 {offsets = [3, 0], sizes = [1, 2], strides = [1, 1]} : vector<8x2xf32> to vector<1x2xf32>
    %364 = vector.broadcast %363 : vector<1x2xf32> to vector<8x2xf32>
    %365 = arith.addf %364, %23 : vector<8x2xf32>
    %366 = arith.cmpf ogt, %365, %360 : vector<8x2xf32>
    %367 = arith.select %366, %365, %360 : vector<8x2xi1>, vector<8x2xf32>
    %c3_i32_61 = arith.constant 3 : i32
    %368 = vector.broadcast %c3_i32_61 : i32 to vector<8x2xi32>
    %369 = arith.select %366, %368, %362 : vector<8x2xi1>, vector<8x2xi32>
    %370 = vector.extract_strided_slice %345 {offsets = [4, 0], sizes = [1, 2], strides = [1, 1]} : vector<8x2xf32> to vector<1x2xf32>
    %371 = vector.broadcast %370 : vector<1x2xf32> to vector<8x2xf32>
    %372 = arith.addf %371, %28 : vector<8x2xf32>
    %373 = arith.cmpf ogt, %372, %367 : vector<8x2xf32>
    %374 = arith.select %373, %372, %367 : vector<8x2xi1>, vector<8x2xf32>
    %c4_i32_62 = arith.constant 4 : i32
    %375 = vector.broadcast %c4_i32_62 : i32 to vector<8x2xi32>
    %376 = arith.select %373, %375, %369 : vector<8x2xi1>, vector<8x2xi32>
    %377 = vector.extract_strided_slice %345 {offsets = [5, 0], sizes = [1, 2], strides = [1, 1]} : vector<8x2xf32> to vector<1x2xf32>
    %378 = vector.broadcast %377 : vector<1x2xf32> to vector<8x2xf32>
    %379 = arith.addf %378, %33 : vector<8x2xf32>
    %380 = arith.cmpf ogt, %379, %374 : vector<8x2xf32>
    %381 = arith.select %380, %379, %374 : vector<8x2xi1>, vector<8x2xf32>
    %c5_i32_63 = arith.constant 5 : i32
    %382 = vector.broadcast %c5_i32_63 : i32 to vector<8x2xi32>
    %383 = arith.select %380, %382, %376 : vector<8x2xi1>, vector<8x2xi32>
    %384 = vector.extract_strided_slice %345 {offsets = [6, 0], sizes = [1, 2], strides = [1, 1]} : vector<8x2xf32> to vector<1x2xf32>
    %385 = vector.broadcast %384 : vector<1x2xf32> to vector<8x2xf32>
    %386 = arith.addf %385, %38 : vector<8x2xf32>
    %387 = arith.cmpf ogt, %386, %381 : vector<8x2xf32>
    %388 = arith.select %387, %386, %381 : vector<8x2xi1>, vector<8x2xf32>
    %c6_i32_64 = arith.constant 6 : i32
    %389 = vector.broadcast %c6_i32_64 : i32 to vector<8x2xi32>
    %390 = arith.select %387, %389, %383 : vector<8x2xi1>, vector<8x2xi32>
    %391 = vector.extract_strided_slice %345 {offsets = [7, 0], sizes = [1, 2], strides = [1, 1]} : vector<8x2xf32> to vector<1x2xf32>
    %392 = vector.broadcast %391 : vector<1x2xf32> to vector<8x2xf32>
    %393 = arith.addf %392, %43 : vector<8x2xf32>
    %394 = arith.cmpf ogt, %393, %388 : vector<8x2xf32>
    %395 = arith.select %394, %393, %388 : vector<8x2xi1>, vector<8x2xf32>
    %c7_i32_65 = arith.constant 7 : i32
    %396 = vector.broadcast %c7_i32_65 : i32 to vector<8x2xi32>
    %397 = arith.select %394, %396, %390 : vector<8x2xi1>, vector<8x2xi32>
    %398 = arith.index_cast %c5_i32_58 : i32 to index
    %c0_66 = arith.constant 0 : index
    %c0_67 = arith.constant 0 : index
    %399 = vector.load %arg4[%398, %c0_66, %c0_67] : memref<8x8x2xi32, #tpu.memory_space<vmem>>, vector<1x8x2xi32>
    %400 = vector.shape_cast %399 : vector<1x8x2xi32> to vector<8x2xi32>
    %401 = vector.shape_cast %397 : vector<8x2xi32> to vector<1x8x2xi32>
    tpu.vector_store %arg4[%398, %c0_66, %c0_67], %401 {strides = array<i32>} : memref<8x8x2xi32, #tpu.memory_space<vmem>>, vector<1x8x2xi32>,
    %402 = arith.index_cast %c5_i32_58 : i32 to index
    %c0_68 = arith.constant 0 : index
    %c0_69 = arith.constant 0 : index
    %403 = vector.load %arg2[%402, %c0_68, %c0_69] : memref<8x8x2xf32, #tpu.memory_space<vmem>>, vector<1x8x2xf32>
    %404 = vector.shape_cast %403 : vector<1x8x2xf32> to vector<8x2xf32>
    %405 = arith.addf %395, %404 : vector<8x2xf32>
    %c6_i32_70 = arith.constant 6 : i32
    %406 = vector.extract_strided_slice %405 {offsets = [0, 0], sizes = [1, 2], strides = [1, 1]} : vector<8x2xf32> to vector<1x2xf32>
    %407 = vector.broadcast %406 : vector<1x2xf32> to vector<8x2xf32>
    %408 = arith.addf %407, %8 : vector<8x2xf32>
    %409 = vector.extract_strided_slice %405 {offsets = [1, 0], sizes = [1, 2], strides = [1, 1]} : vector<8x2xf32> to vector<1x2xf32>
    %410 = vector.broadcast %409 : vector<1x2xf32> to vector<8x2xf32>
    %411 = arith.addf %410, %13 : vector<8x2xf32>
    %412 = arith.cmpf ogt, %411, %408 : vector<8x2xf32>
    %413 = arith.select %412, %411, %408 : vector<8x2xi1>, vector<8x2xf32>
    %c1_i32_71 = arith.constant 1 : i32
    %414 = vector.broadcast %c1_i32_71 : i32 to vector<8x2xi32>
    %415 = arith.select %412, %414, %44 : vector<8x2xi1>, vector<8x2xi32>
    %416 = vector.extract_strided_slice %405 {offsets = [2, 0], sizes = [1, 2], strides = [1, 1]} : vector<8x2xf32> to vector<1x2xf32>
    %417 = vector.broadcast %416 : vector<1x2xf32> to vector<8x2xf32>
    %418 = arith.addf %417, %18 : vector<8x2xf32>
    %419 = arith.cmpf ogt, %418, %413 : vector<8x2xf32>
    %420 = arith.select %419, %418, %413 : vector<8x2xi1>, vector<8x2xf32>
    %c2_i32_72 = arith.constant 2 : i32
    %421 = vector.broadcast %c2_i32_72 : i32 to vector<8x2xi32>
    %422 = arith.select %419, %421, %415 : vector<8x2xi1>, vector<8x2xi32>
    %423 = vector.extract_strided_slice %405 {offsets = [3, 0], sizes = [1, 2], strides = [1, 1]} : vector<8x2xf32> to vector<1x2xf32>
    %424 = vector.broadcast %423 : vector<1x2xf32> to vector<8x2xf32>
    %425 = arith.addf %424, %23 : vector<8x2xf32>
    %426 = arith.cmpf ogt, %425, %420 : vector<8x2xf32>
    %427 = arith.select %426, %425, %420 : vector<8x2xi1>, vector<8x2xf32>
    %c3_i32_73 = arith.constant 3 : i32
    %428 = vector.broadcast %c3_i32_73 : i32 to vector<8x2xi32>
    %429 = arith.select %426, %428, %422 : vector<8x2xi1>, vector<8x2xi32>
    %430 = vector.extract_strided_slice %405 {offsets = [4, 0], sizes = [1, 2], strides = [1, 1]} : vector<8x2xf32> to vector<1x2xf32>
    %431 = vector.broadcast %430 : vector<1x2xf32> to vector<8x2xf32>
    %432 = arith.addf %431, %28 : vector<8x2xf32>
    %433 = arith.cmpf ogt, %432, %427 : vector<8x2xf32>
    %434 = arith.select %433, %432, %427 : vector<8x2xi1>, vector<8x2xf32>
    %c4_i32_74 = arith.constant 4 : i32
    %435 = vector.broadcast %c4_i32_74 : i32 to vector<8x2xi32>
    %436 = arith.select %433, %435, %429 : vector<8x2xi1>, vector<8x2xi32>
    %437 = vector.extract_strided_slice %405 {offsets = [5, 0], sizes = [1, 2], strides = [1, 1]} : vector<8x2xf32> to vector<1x2xf32>
    %438 = vector.broadcast %437 : vector<1x2xf32> to vector<8x2xf32>
    %439 = arith.addf %438, %33 : vector<8x2xf32>
    %440 = arith.cmpf ogt, %439, %434 : vector<8x2xf32>
    %441 = arith.select %440, %439, %434 : vector<8x2xi1>, vector<8x2xf32>
    %c5_i32_75 = arith.constant 5 : i32
    %442 = vector.broadcast %c5_i32_75 : i32 to vector<8x2xi32>
    %443 = arith.select %440, %442, %436 : vector<8x2xi1>, vector<8x2xi32>
    %444 = vector.extract_strided_slice %405 {offsets = [6, 0], sizes = [1, 2], strides = [1, 1]} : vector<8x2xf32> to vector<1x2xf32>
    %445 = vector.broadcast %444 : vector<1x2xf32> to vector<8x2xf32>
    %446 = arith.addf %445, %38 : vector<8x2xf32>
    %447 = arith.cmpf ogt, %446, %441 : vector<8x2xf32>
    %448 = arith.select %447, %446, %441 : vector<8x2xi1>, vector<8x2xf32>
    %c6_i32_76 = arith.constant 6 : i32
    %449 = vector.broadcast %c6_i32_76 : i32 to vector<8x2xi32>
    %450 = arith.select %447, %449, %443 : vector<8x2xi1>, vector<8x2xi32>
    %451 = vector.extract_strided_slice %405 {offsets = [7, 0], sizes = [1, 2], strides = [1, 1]} : vector<8x2xf32> to vector<1x2xf32>
    %452 = vector.broadcast %451 : vector<1x2xf32> to vector<8x2xf32>
    %453 = arith.addf %452, %43 : vector<8x2xf32>
    %454 = arith.cmpf ogt, %453, %448 : vector<8x2xf32>
    %455 = arith.select %454, %453, %448 : vector<8x2xi1>, vector<8x2xf32>
    %c7_i32_77 = arith.constant 7 : i32
    %456 = vector.broadcast %c7_i32_77 : i32 to vector<8x2xi32>
    %457 = arith.select %454, %456, %450 : vector<8x2xi1>, vector<8x2xi32>
    %458 = arith.index_cast %c6_i32_70 : i32 to index
    %c0_78 = arith.constant 0 : index
    %c0_79 = arith.constant 0 : index
    %459 = vector.load %arg4[%458, %c0_78, %c0_79] : memref<8x8x2xi32, #tpu.memory_space<vmem>>, vector<1x8x2xi32>
    %460 = vector.shape_cast %459 : vector<1x8x2xi32> to vector<8x2xi32>
    %461 = vector.shape_cast %457 : vector<8x2xi32> to vector<1x8x2xi32>
    tpu.vector_store %arg4[%458, %c0_78, %c0_79], %461 {strides = array<i32>} : memref<8x8x2xi32, #tpu.memory_space<vmem>>, vector<1x8x2xi32>,
    %462 = arith.index_cast %c6_i32_70 : i32 to index
    %c0_80 = arith.constant 0 : index
    %c0_81 = arith.constant 0 : index
    %463 = vector.load %arg2[%462, %c0_80, %c0_81] : memref<8x8x2xf32, #tpu.memory_space<vmem>>, vector<1x8x2xf32>
    %464 = vector.shape_cast %463 : vector<1x8x2xf32> to vector<8x2xf32>
    %465 = arith.addf %455, %464 : vector<8x2xf32>
    %c7_i32_82 = arith.constant 7 : i32
    %466 = vector.extract_strided_slice %465 {offsets = [0, 0], sizes = [1, 2], strides = [1, 1]} : vector<8x2xf32> to vector<1x2xf32>
    %467 = vector.broadcast %466 : vector<1x2xf32> to vector<8x2xf32>
    %468 = arith.addf %467, %8 : vector<8x2xf32>
    %469 = vector.extract_strided_slice %465 {offsets = [1, 0], sizes = [1, 2], strides = [1, 1]} : vector<8x2xf32> to vector<1x2xf32>
    %470 = vector.broadcast %469 : vector<1x2xf32> to vector<8x2xf32>
    %471 = arith.addf %470, %13 : vector<8x2xf32>
    %472 = arith.cmpf ogt, %471, %468 : vector<8x2xf32>
    %473 = arith.select %472, %471, %468 : vector<8x2xi1>, vector<8x2xf32>
    %c1_i32_83 = arith.constant 1 : i32
    %474 = vector.broadcast %c1_i32_83 : i32 to vector<8x2xi32>
    %475 = arith.select %472, %474, %44 : vector<8x2xi1>, vector<8x2xi32>
    %476 = vector.extract_strided_slice %465 {offsets = [2, 0], sizes = [1, 2], strides = [1, 1]} : vector<8x2xf32> to vector<1x2xf32>
    %477 = vector.broadcast %476 : vector<1x2xf32> to vector<8x2xf32>
    %478 = arith.addf %477, %18 : vector<8x2xf32>
    %479 = arith.cmpf ogt, %478, %473 : vector<8x2xf32>
    %480 = arith.select %479, %478, %473 : vector<8x2xi1>, vector<8x2xf32>
    %c2_i32_84 = arith.constant 2 : i32
    %481 = vector.broadcast %c2_i32_84 : i32 to vector<8x2xi32>
    %482 = arith.select %479, %481, %475 : vector<8x2xi1>, vector<8x2xi32>
    %483 = vector.extract_strided_slice %465 {offsets = [3, 0], sizes = [1, 2], strides = [1, 1]} : vector<8x2xf32> to vector<1x2xf32>
    %484 = vector.broadcast %483 : vector<1x2xf32> to vector<8x2xf32>
    %485 = arith.addf %484, %23 : vector<8x2xf32>
    %486 = arith.cmpf ogt, %485, %480 : vector<8x2xf32>
    %487 = arith.select %486, %485, %480 : vector<8x2xi1>, vector<8x2xf32>
    %c3_i32_85 = arith.constant 3 : i32
    %488 = vector.broadcast %c3_i32_85 : i32 to vector<8x2xi32>
    %489 = arith.select %486, %488, %482 : vector<8x2xi1>, vector<8x2xi32>
    %490 = vector.extract_strided_slice %465 {offsets = [4, 0], sizes = [1, 2], strides = [1, 1]} : vector<8x2xf32> to vector<1x2xf32>
    %491 = vector.broadcast %490 : vector<1x2xf32> to vector<8x2xf32>
    %492 = arith.addf %491, %28 : vector<8x2xf32>
    %493 = arith.cmpf ogt, %492, %487 : vector<8x2xf32>
    %494 = arith.select %493, %492, %487 : vector<8x2xi1>, vector<8x2xf32>
    %c4_i32_86 = arith.constant 4 : i32
    %495 = vector.broadcast %c4_i32_86 : i32 to vector<8x2xi32>
    %496 = arith.select %493, %495, %489 : vector<8x2xi1>, vector<8x2xi32>
    %497 = vector.extract_strided_slice %465 {offsets = [5, 0], sizes = [1, 2], strides = [1, 1]} : vector<8x2xf32> to vector<1x2xf32>
    %498 = vector.broadcast %497 : vector<1x2xf32> to vector<8x2xf32>
    %499 = arith.addf %498, %33 : vector<8x2xf32>
    %500 = arith.cmpf ogt, %499, %494 : vector<8x2xf32>
    %501 = arith.select %500, %499, %494 : vector<8x2xi1>, vector<8x2xf32>
    %c5_i32_87 = arith.constant 5 : i32
    %502 = vector.broadcast %c5_i32_87 : i32 to vector<8x2xi32>
    %503 = arith.select %500, %502, %496 : vector<8x2xi1>, vector<8x2xi32>
    %504 = vector.extract_strided_slice %465 {offsets = [6, 0], sizes = [1, 2], strides = [1, 1]} : vector<8x2xf32> to vector<1x2xf32>
    %505 = vector.broadcast %504 : vector<1x2xf32> to vector<8x2xf32>
    %506 = arith.addf %505, %38 : vector<8x2xf32>
    %507 = arith.cmpf ogt, %506, %501 : vector<8x2xf32>
    %508 = arith.select %507, %506, %501 : vector<8x2xi1>, vector<8x2xf32>
    %c6_i32_88 = arith.constant 6 : i32
    %509 = vector.broadcast %c6_i32_88 : i32 to vector<8x2xi32>
    %510 = arith.select %507, %509, %503 : vector<8x2xi1>, vector<8x2xi32>
    %511 = vector.extract_strided_slice %465 {offsets = [7, 0], sizes = [1, 2], strides = [1, 1]} : vector<8x2xf32> to vector<1x2xf32>
    %512 = vector.broadcast %511 : vector<1x2xf32> to vector<8x2xf32>
    %513 = arith.addf %512, %43 : vector<8x2xf32>
    %514 = arith.cmpf ogt, %513, %508 : vector<8x2xf32>
    %515 = arith.select %514, %513, %508 : vector<8x2xi1>, vector<8x2xf32>
    %c7_i32_89 = arith.constant 7 : i32
    %516 = vector.broadcast %c7_i32_89 : i32 to vector<8x2xi32>
    %517 = arith.select %514, %516, %510 : vector<8x2xi1>, vector<8x2xi32>
    %518 = arith.index_cast %c7_i32_82 : i32 to index
    %c0_90 = arith.constant 0 : index
    %c0_91 = arith.constant 0 : index
    %519 = vector.load %arg4[%518, %c0_90, %c0_91] : memref<8x8x2xi32, #tpu.memory_space<vmem>>, vector<1x8x2xi32>
    %520 = vector.shape_cast %519 : vector<1x8x2xi32> to vector<8x2xi32>
    %521 = vector.shape_cast %517 : vector<8x2xi32> to vector<1x8x2xi32>
    tpu.vector_store %arg4[%518, %c0_90, %c0_91], %521 {strides = array<i32>} : memref<8x8x2xi32, #tpu.memory_space<vmem>>, vector<1x8x2xi32>,
    %522 = arith.index_cast %c7_i32_82 : i32 to index
    %c0_92 = arith.constant 0 : index
    %c0_93 = arith.constant 0 : index
    %523 = vector.load %arg2[%522, %c0_92, %c0_93] : memref<8x8x2xf32, #tpu.memory_space<vmem>>, vector<1x8x2xf32>
    %524 = vector.shape_cast %523 : vector<1x8x2xf32> to vector<8x2xf32>
    %525 = arith.addf %515, %524 : vector<8x2xf32>
    %c8_i32 = arith.constant 8 : i32
    %c0_94 = arith.constant 0 : index
    %c0_95 = arith.constant 0 : index
    %526 = vector.load %arg5[%c0_94, %c0_95] : memref<8x2xf32, #tpu.memory_space<vmem>>, vector<8x2xf32>
    tpu.vector_store %arg5[%c0_94, %c0_95], %525 {strides = array<i32>} : memref<8x2xf32, #tpu.memory_space<vmem>>, vector<8x2xf32>,
    return
  }
  func.func @transform_0(%arg0: i32, %arg1: i32) -> (i32, i32, i32) {
    %c0_i32 = arith.constant 0 : i32
    %0 = arith.minsi %arg1, %c0_i32 : i32
    %c0_i32_0 = arith.constant 0 : i32
    %c0_i32_1 = arith.constant 0 : i32
    return %0, %c0_i32_0, %arg0 : i32, i32, i32
  }
  func.func @transform_1(%arg0: i32, %arg1: i32) -> (i32, i32) {
    %c0_i32 = arith.constant 0 : i32
    %c0_i32_0 = arith.constant 0 : i32
    %c0_i32_1 = arith.constant 0 : i32
    return %c0_i32, %c0_i32_0 : i32, i32
  }
  func.func @transform_2(%arg0: i32, %arg1: i32) -> (i32, i32, i32) {
    %c0_i32 = arith.constant 0 : i32
    %c0_i32_0 = arith.constant 0 : i32
    return %arg1, %c0_i32, %arg0 : i32, i32, i32
  }
}

</mosaic_0001>

<bundles_post_ra>
// kernel: viterbi_decode_device.1
= control target key start
LH: loop header
LB: loop body
LE: loop exit
PB: predicated region body
PF: predicated region fallthrough
CT: control target
= control target key end

     0   :  { %s1308_s9 = smov 0   ;;  %s1310_s10 = smov 0   ;;  %s1621_s0 = inlined_call_operand.vmem [shape: f32[8,8,2], index: 0, kind: input, shape index: {}]   ;;  %s1622_s1 = inlined_call_operand.vmem [shape: f32[8,8], index: 1, kind: input, shape index: {}]   ;;  %s1623_s2 = inlined_call_operand.vmem [shape: s32[9,8,2], index: 2, kind: output, shape index: {}]  }
   0x1   :  { %s1312_s11 = smov 0   ;;  %s1314_s12 = smov 0  }
   0x2   :  { %s1316_s13 = smov 0  }
   0x3 LB: > { %s1015_s14 = sadd.s32 4294967295, %s1250_s13   ;;  %s21_s15 = sadd.s32 1, %s1246_s12  ;;  %s1250_s13 = sphi %s1316_s13, %s12_s13   ;;  %s1246_s12 = sphi %s1314_s12, %s1631_s12   ;;  %s1242_s11 = sphi %s1312_s11, %s1630_s11   ;;  %s1238_s10 = sphi %s1310_s10, %s1629_s10   ;;  %s1234_s9 = sphi %s1308_s9, %s1628_s9  }
   0x4   : > { %p22_p0 = scmp.ge.s32.totalorder %s21_s15, 2  ;;  %s86_s16 = sadd.s32 1, %s1238_s10 }
   0x5   : > { %p96_p1 = scmp.ne.s32.totalorder %s1238_s10, %s1234_s9  ;;  %p97_p2 = scmp.eq.s32.totalorder %s1015_s14, 1 }
   0x6   : > { %s1633_s15 = smov (%p22_p0, %s21_s15), 0  ;;  %p1019_p4 = scmp.ge.s32.totalorder %s1250_s13, 1 }
   0x7   : > { %p1337_p3 = por %p97_p2, %p96_p1  ;;  %s81_s18 = ssub.s32 %s1246_s12, %s1633_s15 }
   0x8   : > { %p140_p5 = scmp.lt.s32.totalorder %s1250_s13, 3  ;;  %p84_p6 = scmp.eq.s32.totalorder %s81_s18, 0 }
   0xa   : > { %p141_p7 = pnand %p1019_p4, %p140_p5 }
   0xb   : > { %s1346_s19 = scalar_select %p84_p6, %s1238_s10, %s86_s16  }
   0xc   : > { %144 = sbr.rel (%p141_p7) target bundleno = 364 (0x16c), region = 28  ;;  %s163_s20 = sand.u32 (!%p141_p7), 1, %s1234_s9  }
   0xd   : > { %p166_p8 = scmp.lt.s32.totalorder (!%p141_p7), %s1242_s11, 0  ;;  %s1020_s21 = sshll.u32 (!%p141_p7), %s163_s20, 6 }
   0xe   : > { %s1355_s28 = scalar_lea.vmem (!%p141_p7), [#allocation3], %s1020_s21   ;;  %p1023_p10 = scmp.ne.s32.totalorder (!%p141_p7), %s1242_s11, 0 }
  0x11   : > { %s167_s22 = scalar_select %p166_p8, %s1242_s11, 0 }
  0x13   : > { %s1021_s23 = sshll.u32 %s167_s22, 3 }
  0x14   : > { %p169_p9 = scmp.lt.s32.totalorder %s1021_s23, 7  ;;  %187 = sbr.rel (%p1023_p10) target bundleno = 32 (0x20), region = 32 }
  0x16   : > { %s1635_s23 = smov (!%p169_p9, %s1021_s23), 7 }
  0x17   : > { %s1022_s24 = sshll.u32 %s1635_s23, 3 }
  0x18   : > { %s1353_s27 = scalar_lea.vmem %s1621_s0, %s1022_s24 }
  0x19   : > { %v188_v0 = vlaneseq  ;;  %vm192_vm0 = vcmask 15360   ;;  %v1284_v2 = vmov -1e+30  }
  0x1b   : > { %v189_v1 = vshrl.u32 %v188_v0, 7 }
  0x1d   : > { %vm190_vm1 = vcmp.eq.s32.totalorder %v189_v1, 6 }
  0x1e   : > { %v191_v3 = vsel %vm190_vm1, 0.0, %v1284_v2 }
  0x1f   : > { %193 = vst.msk [vmem:[#allocation2] sm:$0xff] %vm192_vm0, %v191_v3 }
  0x20 PF: > { %v194_v4 = vld [vmem:[%s1622_s1] sm:$0xff]  ;;  %v1285_v5 = vmov 2   ;;  %v1286_v6 = vmov 0   ;;  %v1287_v7 = vmov 3   ;;  %v1288_v8 = vmov 1   ;;  %s1039_s3 = sshll.u32 (%p1337_p3), %s1242_s11, 3 }
  0x21   : > { %1173 = vset.pattern.permute.xlu1 %v1285_v5  ;;  %1171 = vset.pattern.permute.xlu0 %v1286_v6  ;;  %v1289_v9 = vmov 4   ;;  %v1290_v10 = vmov 5   ;;  %v1291_v11 = vmov 6   ;;  %v1292_v12 = vmov 7   ;;  %v292_v58 = vld [vmem:[%s1353_s27] sm:$0xff]  ;;  %s1055_s4 = sshll.u32 (%p1337_p3), %s1242_s11, 6 }
  0x22   : > { %205 = vperm.xlu1 %1173, %v194_v4   ;;  %197 = vperm.xlu0 %1171, %v194_v4   ;;  %v229_v13 = vlaneseq  ;;  %vm290_vm8 = vcmask 15360   ;;  %s765_s5 = ssub.s32 (%p1337_p3), 9, %s1039_s3  ;;  %s1562_s8 = scalar_lea.vmem (%p1337_p3), %s1623_s2, %s1055_s4  }
  0x23   : > { %p766_p11 = scmp.lt.s32.totalorder (%p1337_p3), %s765_s5, 8 }
  0x24   : > { %v230_v14 = vshrl.u32 %v229_v13, 7 }
  0x26   : > { %1174 = vset.pattern.permute.xlu1 %v1287_v7  ;;  %1172 = vset.pattern.permute.xlu0 %v1288_v8  ;;  %v1362_v15 = vsub.s32 0, %v230_v14  ;;  %v1364_v16 = vsub.s32 1, %v230_v14  ;;  %v1366_v17 = vsub.s32 2, %v230_v14  ;;  %v228_v20 = vld [vmem:[#allocation2] sm:$0xff]  ;;  %v1373_v22 = vsub.s32 3, %v230_v14 }
  0x27   : > { %209 = vperm.xlu1 %1174, %v194_v4   ;;  %201 = vperm.xlu0 %1172, %v194_v4   ;;  %v1376_v24 = vsub.s32 4, %v230_v14  ;;  %v1379_v26 = vsub.s32 5, %v230_v14  ;;  %v1391_v35 = vsub.s32 6, %v230_v14  ;;  %v1402_v47 = vsub.s32 7, %v230_v14 }
  0x28   : > { %v232_v21 = vrot.slane %v228_v20, %v1362_v15  ;;  %v237_v23 = vrot.slane %v228_v20, %v1364_v16  ;;  %v245_v25 = vrot.slane %v228_v20, %v1366_v17  ;;  %v253_v30 = vrot.slane %v228_v20, %v1373_v22 }
  0x29   : > { %v261_v32 = vrot.slane %v228_v20, %v1376_v24  ;;  %v269_v34 = vrot.slane %v228_v20, %v1379_v26  ;;  %v277_v45 = vrot.slane %v228_v20, %v1391_v35  ;;  %v285_v54 = vrot.slane %v228_v20, %v1402_v47 }
  0x2b   : > { %1175 = vset.pattern.permute.xlu1 %v1289_v9  ;;  %1176 = vset.pattern.permute.xlu0 %v1290_v10 }
  0x2c   : > { %213 = vperm.xlu1 %1175, %v194_v4   ;;  %217 = vperm.xlu0 %1176, %v194_v4  }
  0x30   : > { %1177 = vset.pattern.permute.xlu1 %v1291_v11  ;;  %1179 = vset.pattern.permute.xlu0 %v1292_v12 }
  0x31   : > { %221 = vperm.xlu1 %1177, %v194_v4  }
  0x35   : > { %1178 = vset.pattern.permute.xlu1 %v1292_v12 }
  0x36   : > { %225 = vperm.xlu1 %1178, %v194_v4  }
  0x9d   : > { %v1368_v18 = vpop.permute.xlu1 %205  ;;  %v1370_v19 = vpop.permute.xlu0 %197 }
  0x9e   : > { %v233_v29 = vadd.f32 %v232_v21, %v1370_v19  ;;  %v246_v33 = vadd.f32 %v245_v25, %v1368_v18 }
  0xa2   : > { %v1381_v27 = vpop.permute.xlu1 %209  ;;  %v1383_v28 = vpop.permute.xlu0 %201 }
  0xa3   : > { %v238_v31 = vadd.f32 %v237_v23, %v1383_v28  ;;  %v254_v38 = vadd.f32 %v253_v30, %v1381_v27 }
  0xa5   : > { %vm239_vm2 = vcmp.gt.f32.partialorder %v238_v31, %v233_v29 }
  0xa6   : > { %v240_v36 = vsel %vm239_vm2, %v238_v31, %v233_v29  ;;  %v241_v37 = vsel %vm239_vm2, 1, %v1286_v6 }
  0xa7   : > { %v1395_v39 = vpop.permute.xlu1 %213  ;;  %vm247_vm3 = vcmp.gt.f32.partialorder %v246_v33, %v240_v36  ;;  %v1397_v40 = vpop.permute.xlu0 %217 }
  0xa8   : > { %v262_v41 = vadd.f32 %v261_v32, %v1395_v39  ;;  %v248_v42 = vsel %vm247_vm3, %v246_v33, %v240_v36  ;;  %v249_v43 = vsel %vm247_vm3, 2, %v241_v37  ;;  %v270_v44 = vadd.f32 %v269_v34, %v1397_v40 }
  0xa9   : > { %vm255_vm4 = vcmp.gt.f32.partialorder %v254_v38, %v248_v42 }
  0xaa   : > { %v256_v46 = vsel %vm255_vm4, %v254_v38, %v248_v42  ;;  %v257_v48 = vsel %vm255_vm4, 3, %v249_v43  ;;  %v1025_v38 = vld [vmem:[%s1353_s27 + $0x8] sm:$0xff] }
  0xab   : > { %vm263_vm5 = vcmp.gt.f32.partialorder %v262_v41, %v256_v46 }
  0xac   : > { %v264_v49 = vsel %vm263_vm5, %v262_v41, %v256_v46  ;;  %v1404_v50 = vpop.permute.xlu1 %221  ;;  %v265_v52 = vsel %vm263_vm5, 4, %v257_v48 }
  0xad   : > { %vm271_vm6 = vcmp.gt.f32.partialorder %v270_v44, %v264_v49  ;;  %v278_v51 = vadd.f32 %v277_v45, %v1404_v50 }
  0xae   : > { %v272_v53 = vsel %vm271_vm6, %v270_v44, %v264_v49  ;;  %v273_v55 = vsel %vm271_vm6, 5, %v265_v52 }
  0xaf   : > { %vm279_vm7 = vcmp.gt.f32.partialorder %v278_v51, %v272_v53 }
  0xb0   : > { %v280_v59 = vsel %vm279_vm7, %v278_v51, %v272_v53  ;;  %v281_v60 = vsel %vm279_vm7, 6, %v273_v55 }
  0xb1   : > { %v1408_v56 = vpop.permute.xlu1 %225 }
  0xb2   : > { %v286_v57 = vadd.f32 %v285_v54, %v1408_v56 }
  0xb4   : > { %vm287_vm9 = vcmp.gt.f32.partialorder %v286_v57, %v280_v59 }
  0xb5   : > { %v288_v61 = vsel %vm287_vm9, %v286_v57, %v280_v59  ;;  %v289_v62 = vsel %vm287_vm9, 7, %v281_v60 }
  0xb6   : > { %291 = vst.msk [vmem:[%s1355_s28] sm:$0xff] %vm290_vm8, %v289_v62  ;;  %v293_v63 = vadd.f32 %v292_v58, %v288_v61 }
  0xb8   : > { %v297_v0 = vrot.slane %v293_v63, %v1362_v15  ;;  %v302_v1 = vrot.slane %v293_v63, %v1364_v16  ;;  %v310_v2 = vrot.slane %v293_v63, %v1366_v17  ;;  %v318_v5 = vrot.slane %v293_v63, %v1373_v22 }
  0xb9   : > { %v326_v8 = vrot.slane %v293_v63, %v1376_v24  ;;  %v334_v12 = vrot.slane %v293_v63, %v1379_v26  ;;  %v342_v21 = vrot.slane %v293_v63, %v1391_v35  ;;  %v350_v30 = vrot.slane %v293_v63, %v1402_v47 }
  0xba   : > { %v298_v3 = vadd.f32 %v297_v0, %v1370_v19  ;;  %v303_v4 = vadd.f32 %v302_v1, %v1383_v28  ;;  %v311_v7 = vadd.f32 %v310_v2, %v1368_v18  ;;  %v319_v11 = vadd.f32 %v318_v5, %v1381_v27 }
  0xbb   : > { %v327_v20 = vadd.f32 %v326_v8, %v1395_v39  ;;  %v335_v29 = vadd.f32 %v334_v12, %v1397_v40  ;;  %v343_v33 = vadd.f32 %v342_v21, %v1404_v50  ;;  %v351_v37 = vadd.f32 %v350_v30, %v1408_v56  ;;  %v1027_v12 = vld [vmem:[%s1353_s27 + $0x10] sm:$0xff] }
  0xbc   : > { %vm304_vm10 = vcmp.gt.f32.partialorder %v303_v4, %v298_v3 }
  0xbd   : > { %v305_v9 = vsel %vm304_vm10, %v303_v4, %v298_v3  ;;  %v306_v10 = vsel %vm304_vm10, 1, %v1286_v6 }
  0xbe   : > { %vm312_vm11 = vcmp.gt.f32.partialorder %v311_v7, %v305_v9 }
  0xbf   : > { %v313_v13 = vsel %vm312_vm11, %v311_v7, %v305_v9  ;;  %v314_v14 = vsel %vm312_vm11, 2, %v306_v10 }
  0xc0   : > { %vm320_vm12 = vcmp.gt.f32.partialorder %v319_v11, %v313_v13 }
  0xc1   : > { %v321_v23 = vsel %vm320_vm12, %v319_v11, %v313_v13  ;;  %v322_v25 = vsel %vm320_vm12, 3, %v314_v14 }
  0xc2   : > { %vm328_vm13 = vcmp.gt.f32.partialorder %v327_v20, %v321_v23 }
  0xc3   : > { %v329_v31 = vsel %vm328_vm13, %v327_v20, %v321_v23  ;;  %v330_v32 = vsel %vm328_vm13, 4, %v322_v25 }
  0xc4   : > { %vm336_vm14 = vcmp.gt.f32.partialorder %v335_v29, %v329_v31 }
  0xc5   : > { %v337_v34 = vsel %vm336_vm14, %v335_v29, %v329_v31  ;;  %v338_v36 = vsel %vm336_vm14, 5, %v330_v32 }
  0xc6   : > { %vm344_vm15 = vcmp.gt.f32.partialorder %v343_v33, %v337_v34 }
  0xc7   : > { %v345_v41 = vsel %vm344_vm15, %v343_v33, %v337_v34  ;;  %v346_v42 = vsel %vm344_vm15, 6, %v338_v36 }
  0xc8   : > { %vm352_vm0 = vcmp.gt.f32.partialorder %v351_v37, %v345_v41 }
  0xc9   : > { %v353_v43 = vsel %vm352_vm0, %v351_v37, %v345_v41  ;;  %v354_v44 = vsel %vm352_vm0, 7, %v346_v42 }
  0xca   : > { %1024 = vst.msk [vmem:[%s1355_s28 + $0x8] sm:$0xff] %vm290_vm8, %v354_v44  ;;  %v359_v45 = vadd.f32 %v1025_v38, %v353_v43 }
  0xcc   : > { %v363_v46 = vrot.slane %v359_v45, %v1362_v15  ;;  %v368_v48 = vrot.slane %v359_v45, %v1364_v16  ;;  %v376_v49 = vrot.slane %v359_v45, %v1366_v17  ;;  %v384_v53 = vrot.slane %v359_v45, %v1373_v22 }
  0xcd   : > { %v392_v55 = vrot.slane %v359_v45, %v1376_v24  ;;  %v400_v60 = vrot.slane %v359_v45, %v1379_v26  ;;  %v408_v0 = vrot.slane %v359_v45, %v1391_v35  ;;  %v416_v4 = vrot.slane %v359_v45, %v1402_v47 }
  0xce   : > { %v364_v51 = vadd.f32 %v363_v46, %v1370_v19  ;;  %v369_v52 = vadd.f32 %v368_v48, %v1383_v28  ;;  %v377_v54 = vadd.f32 %v376_v49, %v1368_v18  ;;  %v385_v59 = vadd.f32 %v384_v53, %v1381_v27 }
  0xcf   : > { %v393_v63 = vadd.f32 %v392_v55, %v1395_v39  ;;  %v401_v3 = vadd.f32 %v400_v60, %v1397_v40  ;;  %v409_v8 = vadd.f32 %v408_v0, %v1404_v50  ;;  %v417_v11 = vadd.f32 %v416_v4, %v1408_v56  ;;  %v1029_v60 = vld [vmem:[%s1353_s27 + $0x18] sm:$0xff] }
  0xd0   : > { %vm370_vm1 = vcmp.gt.f32.partialorder %v369_v52, %v364_v51 }
  0xd1   : > { %v371_v57 = vsel %vm370_vm1, %v369_v52, %v364_v51  ;;  %v372_v58 = vsel %vm370_vm1, 1, %v1286_v6 }
  0xd2   : > { %vm378_vm2 = vcmp.gt.f32.partialorder %v377_v54, %v371_v57 }
  0xd3   : > { %v379_v61 = vsel %vm378_vm2, %v377_v54, %v371_v57  ;;  %v380_v62 = vsel %vm378_vm2, 2, %v372_v58 }
  0xd4   : > { %vm386_vm3 = vcmp.gt.f32.partialorder %v385_v59, %v379_v61 }
  0xd5   : > { %v387_v1 = vsel %vm386_vm3, %v385_v59, %v379_v61  ;;  %v388_v2 = vsel %vm386_vm3, 3, %v380_v62 }
  0xd6   : > { %vm394_vm4 = vcmp.gt.f32.partialorder %v393_v63, %v387_v1 }
  0xd7   : > { %v395_v5 = vsel %vm394_vm4, %v393_v63, %v387_v1  ;;  %v396_v7 = vsel %vm394_vm4, 4, %v388_v2 }
  0xd8   : > { %vm402_vm5 = vcmp.gt.f32.partialorder %v401_v3, %v395_v5 }
  0xd9   : > { %v403_v9 = vsel %vm402_vm5, %v401_v3, %v395_v5  ;;  %v404_v10 = vsel %vm402_vm5, 5, %v396_v7 }
  0xda   : > { %vm410_vm6 = vcmp.gt.f32.partialorder %v409_v8, %v403_v9 }
  0xdb   : > { %v411_v13 = vsel %vm410_vm6, %v409_v8, %v403_v9  ;;  %v412_v14 = vsel %vm410_vm6, 6, %v404_v10 }
  0xdc   : > { %vm418_vm7 = vcmp.gt.f32.partialorder %v417_v11, %v411_v13 }
  0xdd   : > { %v419_v20 = vsel %vm418_vm7, %v417_v11, %v411_v13  ;;  %v420_v21 = vsel %vm418_vm7, 7, %v412_v14 }
  0xde   : > { %1026 = vst.msk [vmem:[%s1355_s28 + $0x10] sm:$0xff] %vm290_vm8, %v420_v21  ;;  %v425_v23 = vadd.f32 %v1027_v12, %v419_v20 }
  0xe0   : > { %v429_v25 = vrot.slane %v425_v23, %v1362_v15  ;;  %v434_v29 = vrot.slane %v425_v23, %v1364_v16  ;;  %v442_v30 = vrot.slane %v425_v23, %v1366_v17  ;;  %v450_v33 = vrot.slane %v425_v23, %v1373_v22 }
  0xe1   : > { %v458_v36 = vrot.slane %v425_v23, %v1376_v24  ;;  %v466_v42 = vrot.slane %v425_v23, %v1379_v26  ;;  %v474_v46 = vrot.slane %v425_v23, %v1391_v35  ;;  %v482_v52 = vrot.slane %v425_v23, %v1402_v47 }
  0xe2   : > { %v430_v31 = vadd.f32 %v429_v25, %v1370_v19  ;;  %v435_v32 = vadd.f32 %v434_v29, %v1383_v28  ;;  %v443_v34 = vadd.f32 %v442_v30, %v1368_v18  ;;  %v451_v41 = vadd.f32 %v450_v33, %v1381_v27 }
  0xe3   : > { %v459_v45 = vadd.f32 %v458_v36, %v1395_v39  ;;  %v467_v51 = vadd.f32 %v466_v42, %v1397_v40  ;;  %v475_v55 = vadd.f32 %v474_v46, %v1404_v50  ;;  %v483_v59 = vadd.f32 %v482_v52, %v1408_v56  ;;  %v1031_v42 = vld [vmem:[%s1353_s27 + $0x20] sm:$0xff] }
  0xe4   : > { %vm436_vm9 = vcmp.gt.f32.partialorder %v435_v32, %v430_v31 }
  0xe5   : > { %v437_v37 = vsel %vm436_vm9, %v435_v32, %v430_v31  ;;  %v438_v38 = vsel %vm436_vm9, 1, %v1286_v6 }
  0xe6   : > { %vm444_vm10 = vcmp.gt.f32.partialorder %v443_v34, %v437_v37 }
  0xe7   : > { %v445_v43 = vsel %vm444_vm10, %v443_v34, %v437_v37  ;;  %v446_v44 = vsel %vm444_vm10, 2, %v438_v38 }
  0xe8   : > { %vm452_vm11 = vcmp.gt.f32.partialorder %v451_v41, %v445_v43 }
  0xe9   : > { %v453_v48 = vsel %vm452_vm11, %v451_v41, %v445_v43  ;;  %v454_v49 = vsel %vm452_vm11, 3, %v446_v44 }
  0xea   : > { %vm460_vm12 = vcmp.gt.f32.partialorder %v459_v45, %v453_v48 }
  0xeb   : > { %v461_v53 = vsel %vm460_vm12, %v459_v45, %v453_v48  ;;  %v462_v54 = vsel %vm460_vm12, 4, %v454_v49 }
  0xec   : > { %vm468_vm13 = vcmp.gt.f32.partialorder %v467_v51, %v461_v53 }
  0xed   : > { %v469_v57 = vsel %vm468_vm13, %v467_v51, %v461_v53  ;;  %v470_v58 = vsel %vm468_vm13, 5, %v462_v54 }
  0xee   : > { %vm476_vm14 = vcmp.gt.f32.partialorder %v475_v55, %v469_v57 }
  0xef   : > { %v477_v61 = vsel %vm476_vm14, %v475_v55, %v469_v57  ;;  %v478_v62 = vsel %vm476_vm14, 6, %v470_v58 }
  0xf0   : > { %vm484_vm15 = vcmp.gt.f32.partialorder %v483_v59, %v477_v61 }
  0xf1   : > { %v485_v63 = vsel %vm484_vm15, %v483_v59, %v477_v61  ;;  %v486_v0 = vsel %vm484_vm15, 7, %v478_v62 }
  0xf2   : > { %1028 = vst.msk [vmem:[%s1355_s28 + $0x18] sm:$0xff] %vm290_vm8, %v486_v0  ;;  %v491_v1 = vadd.f32 %v1029_v60, %v485_v63 }
  0xf4   : > { %v495_v2 = vrot.slane %v491_v1, %v1362_v15  ;;  %v500_v3 = vrot.slane %v491_v1, %v1364_v16  ;;  %v508_v4 = vrot.slane %v491_v1, %v1366_v17  ;;  %v516_v8 = vrot.slane %v491_v1, %v1373_v22 }
  0xf5   : > { %v524_v10 = vrot.slane %v491_v1, %v1376_v24  ;;  %v532_v14 = vrot.slane %v491_v1, %v1379_v26  ;;  %v540_v25 = vrot.slane %v491_v1, %v1391_v35  ;;  %v548_v32 = vrot.slane %v491_v1, %v1402_v47 }
  0xf6   : > { %v496_v5 = vadd.f32 %v495_v2, %v1370_v19  ;;  %v501_v7 = vadd.f32 %v500_v3, %v1383_v28  ;;  %v509_v9 = vadd.f32 %v508_v4, %v1368_v18  ;;  %v517_v13 = vadd.f32 %v516_v8, %v1381_v27 }
  0xf7   : > { %v525_v23 = vadd.f32 %v524_v10, %v1395_v39  ;;  %v533_v31 = vadd.f32 %v532_v14, %v1397_v40  ;;  %v541_v36 = vadd.f32 %v540_v25, %v1404_v50  ;;  %v549_v41 = vadd.f32 %v548_v32, %v1408_v56  ;;  %v1033_v14 = vld [vmem:[%s1353_s27 + $0x28] sm:$0xff] }
  0xf8   : > { %vm502_vm0 = vcmp.gt.f32.partialorder %v501_v7, %v496_v5 }
  0xf9   : > { %v503_v11 = vsel %vm502_vm0, %v501_v7, %v496_v5  ;;  %v504_v12 = vsel %vm502_vm0, 1, %v1286_v6 }
  0xfa   : > { %vm510_vm1 = vcmp.gt.f32.partialorder %v509_v9, %v503_v11 }
  0xfb   : > { %v511_v20 = vsel %vm510_vm1, %v509_v9, %v503_v11  ;;  %v512_v21 = vsel %vm510_vm1, 2, %v504_v12 }
  0xfc   : > { %vm518_vm2 = vcmp.gt.f32.partialorder %v517_v13, %v511_v20 }
  0xfd   : > { %v519_v29 = vsel %vm518_vm2, %v517_v13, %v511_v20  ;;  %v520_v30 = vsel %vm518_vm2, 3, %v512_v21 }
  0xfe   : > { %vm526_vm3 = vcmp.gt.f32.partialorder %v525_v23, %v519_v29 }
  0xff   : > { %v527_v33 = vsel %vm526_vm3, %v525_v23, %v519_v29  ;;  %v528_v34 = vsel %vm526_vm3, 4, %v520_v30 }
 0x100   : > { %vm534_vm4 = vcmp.gt.f32.partialorder %v533_v31, %v527_v33 }
 0x101   : > { %v535_v37 = vsel %vm534_vm4, %v533_v31, %v527_v33  ;;  %v536_v38 = vsel %vm534_vm4, 5, %v528_v34 }
 0x102   : > { %vm542_vm5 = vcmp.gt.f32.partialorder %v541_v36, %v535_v37 }
 0x103   : > { %v543_v43 = vsel %vm542_vm5, %v541_v36, %v535_v37  ;;  %v544_v44 = vsel %vm542_vm5, 6, %v536_v38 }
 0x104   : > { %vm550_vm6 = vcmp.gt.f32.partialorder %v549_v41, %v543_v43 }
 0x105   : > { %v551_v45 = vsel %vm550_vm6, %v549_v41, %v543_v43  ;;  %v552_v46 = vsel %vm550_vm6, 7, %v544_v44 }
 0x106   : > { %1030 = vst.msk [vmem:[%s1355_s28 + $0x20] sm:$0xff] %vm290_vm8, %v552_v46  ;;  %v557_v48 = vadd.f32 %v1031_v42, %v551_v45 }
 0x108   : > { %v561_v49 = vrot.slane %v557_v48, %v1362_v15  ;;  %v566_v51 = vrot.slane %v557_v48, %v1364_v16  ;;  %v574_v52 = vrot.slane %v557_v48, %v1366_v17  ;;  %v582_v55 = vrot.slane %v557_v48, %v1373_v22 }
 0x109   : > { %v590_v58 = vrot.slane %v557_v48, %v1376_v24  ;;  %v598_v62 = vrot.slane %v557_v48, %v1379_v26  ;;  %v606_v2 = vrot.slane %v557_v48, %v1391_v35  ;;  %v614_v7 = vrot.slane %v557_v48, %v1402_v47 }
 0x10a   : > { %v562_v53 = vadd.f32 %v561_v49, %v1370_v19  ;;  %v567_v54 = vadd.f32 %v566_v51, %v1383_v28  ;;  %v575_v57 = vadd.f32 %v574_v52, %v1368_v18  ;;  %v583_v61 = vadd.f32 %v582_v55, %v1381_v27 }
 0x10b   : > { %v591_v1 = vadd.f32 %v590_v58, %v1395_v39  ;;  %v599_v5 = vadd.f32 %v598_v62, %v1397_v40  ;;  %v607_v10 = vadd.f32 %v606_v2, %v1404_v50  ;;  %v615_v13 = vadd.f32 %v614_v7, %v1408_v56  ;;  %v1035_v62 = vld [vmem:[%s1353_s27 + $0x30] sm:$0xff] }
 0x10c   : > { %vm568_vm7 = vcmp.gt.f32.partialorder %v567_v54, %v562_v53 }
 0x10d   : > { %v569_v59 = vsel %vm568_vm7, %v567_v54, %v562_v53  ;;  %v570_v60 = vsel %vm568_vm7, 1, %v1286_v6 }
 0x10e   : > { %vm576_vm9 = vcmp.gt.f32.partialorder %v575_v57, %v569_v59 }
 0x10f   : > { %v577_v63 = vsel %vm576_vm9, %v575_v57, %v569_v59  ;;  %v578_v0 = vsel %vm576_vm9, 2, %v570_v60 }
 0x110   : > { %vm584_vm10 = vcmp.gt.f32.partialorder %v583_v61, %v577_v63 }
 0x111   : > { %v585_v3 = vsel %vm584_vm10, %v583_v61, %v577_v63  ;;  %v586_v4 = vsel %vm584_vm10, 3, %v578_v0 }
 0x112   : > { %vm592_vm11 = vcmp.gt.f32.partialorder %v591_v1, %v585_v3 }
 0x113   : > { %v593_v8 = vsel %vm592_vm11, %v591_v1, %v585_v3  ;;  %v594_v9 = vsel %vm592_vm11, 4, %v586_v4 }
 0x114   : > { %vm600_vm12 = vcmp.gt.f32.partialorder %v599_v5, %v593_v8 }
 0x115   : > { %v601_v11 = vsel %vm600_vm12, %v599_v5, %v593_v8  ;;  %v602_v12 = vsel %vm600_vm12, 5, %v594_v9 }
 0x116   : > { %vm608_vm13 = vcmp.gt.f32.partialorder %v607_v10, %v601_v11 }
 0x117   : > { %v609_v20 = vsel %vm608_vm13, %v607_v10, %v601_v11  ;;  %v610_v21 = vsel %vm608_vm13, 6, %v602_v12 }
 0x118   : > { %vm616_vm14 = vcmp.gt.f32.partialorder %v615_v13, %v609_v20 }
 0x119   : > { %v617_v23 = vsel %vm616_vm14, %v615_v13, %v609_v20  ;;  %v618_v25 = vsel %vm616_vm14, 7, %v610_v21 }
 0x11a   : > { %1032 = vst.msk [vmem:[%s1355_s28 + $0x28] sm:$0xff] %vm290_vm8, %v618_v25  ;;  %v623_v29 = vadd.f32 %v1033_v14, %v617_v23 }
 0x11c   : > { %v627_v30 = vrot.slane %v623_v29, %v1362_v15  ;;  %v632_v31 = vrot.slane %v623_v29, %v1364_v16  ;;  %v640_v32 = vrot.slane %v623_v29, %v1366_v17  ;;  %v648_v36 = vrot.slane %v623_v29, %v1373_v22 }
 0x11d   : > { %v656_v38 = vrot.slane %v623_v29, %v1376_v24  ;;  %v664_v44 = vrot.slane %v623_v29, %v1379_v26  ;;  %v672_v49 = vrot.slane %v623_v29, %v1391_v35  ;;  %v680_v54 = vrot.slane %v623_v29, %v1402_v47  ;;  %v1037_v29 = vld [vmem:[%s1353_s27 + $0x38] sm:$0xff] }
 0x11e   : > { %v628_v33 = vadd.f32 %v627_v30, %v1370_v19  ;;  %v633_v34 = vadd.f32 %v632_v31, %v1383_v28  ;;  %v641_v37 = vadd.f32 %v640_v32, %v1368_v18  ;;  %v649_v43 = vadd.f32 %v648_v36, %v1381_v27 }
 0x11f   : > { %v657_v48 = vadd.f32 %v656_v38, %v1395_v39  ;;  %v665_v53 = vadd.f32 %v664_v44, %v1397_v40  ;;  %v673_v58 = vadd.f32 %v672_v49, %v1404_v50  ;;  %v681_v61 = vadd.f32 %v680_v54, %v1408_v56 }
 0x120   : > { %vm634_vm15 = vcmp.gt.f32.partialorder %v633_v34, %v628_v33 }
 0x121   : > { %v635_v41 = vsel %vm634_vm15, %v633_v34, %v628_v33  ;;  %v636_v42 = vsel %vm634_vm15, 1, %v1286_v6 }
 0x122   : > { %vm642_vm0 = vcmp.gt.f32.partialorder %v641_v37, %v635_v41 }
 0x123   : > { %v643_v45 = vsel %vm642_vm0, %v641_v37, %v635_v41  ;;  %v644_v46 = vsel %vm642_vm0, 2, %v636_v42 }
 0x124   : > { %vm650_vm1 = vcmp.gt.f32.partialorder %v649_v43, %v643_v45 }
 0x125   : > { %v651_v51 = vsel %vm650_vm1, %v649_v43, %v643_v45  ;;  %v652_v52 = vsel %vm650_vm1, 3, %v644_v46 }
 0x126   : > { %vm658_vm2 = vcmp.gt.f32.partialorder %v657_v48, %v651_v51 }
 0x127   : > { %v659_v55 = vsel %vm658_vm2, %v657_v48, %v651_v51  ;;  %v660_v57 = vsel %vm658_vm2, 4, %v652_v52 }
 0x128   : > { %vm666_vm3 = vcmp.gt.f32.partialorder %v665_v53, %v659_v55 }
 0x129   : > { %v667_v59 = vsel %vm666_vm3, %v665_v53, %v659_v55  ;;  %v668_v60 = vsel %vm666_vm3, 5, %v660_v57 }
 0x12a   : > { %vm674_vm4 = vcmp.gt.f32.partialorder %v673_v58, %v667_v59 }
 0x12b   : > { %v675_v63 = vsel %vm674_vm4, %v673_v58, %v667_v59  ;;  %v676_v0 = vsel %vm674_vm4, 6, %v668_v60 }
 0x12c   : > { %vm682_vm5 = vcmp.gt.f32.partialorder %v681_v61, %v675_v63 }
 0x12d   : > { %v683_v1 = vsel %vm682_vm5, %v681_v61, %v675_v63  ;;  %v684_v2 = vsel %vm682_vm5, 7, %v676_v0 }
 0x12e   : > { %1034 = vst.msk [vmem:[%s1355_s28 + $0x30] sm:$0xff] %vm290_vm8, %v684_v2  ;;  %v689_v3 = vadd.f32 %v1035_v62, %v683_v1 }
 0x130   : > { %v693_v4 = vrot.slane %v689_v3, %v1362_v15  ;;  %v698_v5 = vrot.slane %v689_v3, %v1364_v16  ;;  %v706_v7 = vrot.slane %v689_v3, %v1366_v17  ;;  %v714_v10 = vrot.slane %v689_v3, %v1373_v22 }
 0x131   : > { %v722_v12 = vrot.slane %v689_v3, %v1376_v24  ;;  %v730_v16 = vrot.slane %v689_v3, %v1379_v26  ;;  %v738_v22 = vrot.slane %v689_v3, %v1391_v35 }
 0x132   : > { %v694_v8 = vadd.f32 %v693_v4, %v1370_v19  ;;  %v699_v9 = vadd.f32 %v698_v5, %v1383_v28  ;;  %v707_v11 = vadd.f32 %v706_v7, %v1368_v18  ;;  %v715_v15 = vadd.f32 %v714_v10, %v1381_v27 }
 0x133   : > { %v723_v19 = vadd.f32 %v722_v12, %v1395_v39  ;;  %v731_v24 = vadd.f32 %v730_v16, %v1397_v40  ;;  %v739_v26 = vadd.f32 %v738_v22, %v1404_v50 }
 0x134   : > { %vm700_vm6 = vcmp.gt.f32.partialorder %v699_v9, %v694_v8 }
 0x135   : > { %v701_v13 = vsel %vm700_vm6, %v699_v9, %v694_v8  ;;  %v702_v14 = vsel %vm700_vm6, 1, %v1286_v6  ;;  %v746_v6 = vrot.slane %v689_v3, %v1402_v47 }
 0x136   : > { %vm708_vm7 = vcmp.gt.f32.partialorder %v707_v11, %v701_v13 }
 0x137   : > { %v709_v17 = vsel %vm708_vm7, %v707_v11, %v701_v13  ;;  %v710_v20 = vsel %vm708_vm7, 2, %v702_v14  ;;  %v747_v39 = vadd.f32 %v746_v6, %v1408_v56 }
 0x138   : > { %vm716_vm9 = vcmp.gt.f32.partialorder %v715_v15, %v709_v17 }
 0x139   : > { %v717_v28 = vsel %vm716_vm9, %v715_v15, %v709_v17  ;;  %v718_v18 = vsel %vm716_vm9, 3, %v710_v20 }
 0x13a   : > { %vm724_vm10 = vcmp.gt.f32.partialorder %v723_v19, %v717_v28 }
 0x13b   : > { %v725_v21 = vsel %vm724_vm10, %v723_v19, %v717_v28  ;;  %v726_v27 = vsel %vm724_vm10, 4, %v718_v18 }
 0x13c   : > { %vm732_vm11 = vcmp.gt.f32.partialorder %v731_v24, %v725_v21 }
 0x13d   : > { %v733_v23 = vsel %vm732_vm11, %v731_v24, %v725_v21  ;;  %v734_v25 = vsel %vm732_vm11, 5, %v726_v27 }
 0x13e   : > { %vm740_vm12 = vcmp.gt.f32.partialorder %v739_v26, %v733_v23 }
 0x13f   : > { %v741_v35 = vsel %vm740_vm12, %v739_v26, %v733_v23  ;;  %v742_v30 = vsel %vm740_vm12, 6, %v734_v25 }
 0x140   : > { %vm748_vm13 = vcmp.gt.f32.partialorder %v747_v39, %v741_v35  ;;  %763 = sbr.rel (!%p1337_p3) target bundleno = 364 (0x16c), region = 36 }
 0x141   : > { %v749_v31 = vsel %vm748_vm13, %v747_v39, %v741_v35  ;;  %v750_v32 = vsel %vm748_vm13, 7, %v742_v30 }
 0x142   : > { %1036 = vst.msk [vmem:[%s1355_s28 + $0x38] sm:$0xff] %vm290_vm8, %v750_v32  ;;  %v755_v40 = vadd.f32 %v1037_v29, %v749_v31 }
 0x144   : > { %756 = vst.msk [vmem:[#allocation2] sm:$0xff] %vm290_vm8, %v755_v40 }
 0x145   : > { %s1637_s5 = smov (!%p766_p11, %s765_s5), 8 }
 0x146   : > { %s1040_s9 = sshll.u32 %s1637_s5, 7 }
 0x147   : > { %p1043_p12 = scmp.eq.s32.totalorder %s1040_s9, 0 }
 0x148   : > { %s1568_s14 = sshrl.u32 (!%p1043_p12), %s1637_s5, 3 }
 0x149   : > { %775 = sbr.rel (%p1043_p12) target bundleno = 364 (0x16c), region = 40  ;;  %p1044_p13 = scmp.le.s32.totalorder (!%p1043_p12), %s1568_s14, 0 }
 0x14e   : > { %963 = sbr.rel (%p1044_p13) target bundleno = 347 (0x15b), region = 130  ;;  %s1625_s11 = smov (!%p1044_p13), %s1562_s8 }
 0x14f   : > { %s1626_s16 = smov (!%p1044_p13), %s1355_s28  ;;  %s1577_s17 = smov (!%p1044_p13), 0  }
 0x150   : > { %s1579_s18 = smov (!%p1044_p13), 0  }
 0x153 LB: >> { %v852_v47 = vld [vmem:[%s1258_s16] sm:$0xff]  ;;  %v854_v50 = vld [vmem:[%s1258_s16 + $0x8] sm:$0xff]  ;;  %v856_v56 = vld [vmem:[%s1258_s16 + $0x10] sm:$0xff]  ;;  %s868_s20 = sadd.s32 1, %s1262_s17  ;;  %s846_s18 = sadd.s32 1, %s1266_s18   ;;  %s1266_s18 = sphi %s1579_s18, %s846_s18   ;;  %s1262_s17 = sphi %s1577_s17, %s1627_s17   ;;  %s1258_s16 = sphi %s1626_s16, %s873_s16   ;;  %s1254_s11 = sphi %s1625_s11, %s874_s11  }
 0x154   : >> { %853 = vst [vmem:[%s1254_s11] sm:$0xff] %v852_v47  ;;  %855 = vst [vmem:[%s1254_s11 + $0x8] sm:$0xff] %v854_v50  ;;  %v858_v33 = vld [vmem:[%s1258_s16 + $0x18] sm:$0xff]  ;;  %v860_v34 = vld [vmem:[%s1258_s16 + $0x20] sm:$0xff]  ;;  %p869_p0 = scmp.ge.s32.totalorder %s868_s20, %s1568_s14  ;;  %p845_p1 = scmp.ge.s32.totalorder %s846_s18, %s1568_s14 }
 0x155   : >> { %857 = vst [vmem:[%s1254_s11 + $0x10] sm:$0xff] %v856_v56  ;;  %v862_v36 = vld [vmem:[%s1258_s16 + $0x28] sm:$0xff]  ;;  %859 = vst [vmem:[%s1254_s11 + $0x18] sm:$0xff] %v858_v33  ;;  %v864_v37 = vld [vmem:[%s1258_s16 + $0x30] sm:$0xff] }
 0x156   : >> { %861 = vst [vmem:[%s1254_s11 + $0x20] sm:$0xff] %v860_v34  ;;  %863 = vst [vmem:[%s1254_s11 + $0x28] sm:$0xff] %v862_v36  ;;  %v866_v38 = vld [vmem:[%s1258_s16 + $0x38] sm:$0xff]  ;;  %s1639_s20 = smov (%p869_p0, %s868_s20), 0  ;;  %848 = sbr.rel (!%p845_p1) target bundleno = 339 (0x153), region = 136 }
 0x157   : >> { %865 = vst [vmem:[%s1254_s11 + $0x30] sm:$0xff] %v864_v37  ;;  %867 = vst [vmem:[%s1254_s11 + $0x38] sm:$0xff] %v866_v38  ;;  %s1045_s21 = sshll.u32 %s1639_s20, 6  ;;  %s1627_s17 = smov %s1639_s20 }
 0x158   : >> { %s873_s16 = scalar_lea.vmem %s1355_s28, %s1045_s21 [#allocation3]   ;;  %s874_s11 = scalar_lea.vmem %s1562_s8, %s1045_s21  }
 0x15b PF: > { %s1598_s22 = sand.u32 7, %s1637_s5   ;;  %s1056_s23 = sshll.u32 %s1568_s14, 6 }
 0x15c   : > { %s879_s24 = scalar_lea.vmem %s1355_s28, %s1056_s23 [#allocation3]   ;;  %s881_s25 = scalar_lea.vmem %s1562_s8, %s1056_s23  }
 0x15d   : > { %p1050_p2 = scmp.le.s32.totalorder %s1598_s22, 0 }
 0x15e   : > { %s1268_s26 = smov (!%p1050_p2), %s881_s25   ;;  %s1272_s27 = smov (!%p1050_p2), %s879_s24  }
 0x15f   : > { %977 = sbr.rel (%p1050_p2) target bundleno = 364 (0x16c), region = 141  ;;  %s1276_s29 = smov (!%p1050_p2), 0  }
 0x160   : > { %s1280_s30 = smov (!%p1050_p2), 0  }
 0x164 LB: >> { %v891_v41 = vld [vmem:[%s1274_s27] sm:$0xff]  ;;  %s893_s3 = sadd.s32 1, %s1278_s29  ;;  %s885_s30 = sadd.s32 1, %s1282_s30   ;;  %s1282_s30 = sphi %s1280_s30, %s885_s30   ;;  %s1278_s29 = sphi %s1276_s29, %s1277_s29   ;;  %s1274_s27 = sphi %s1272_s27, %s898_s27   ;;  %s1270_s26 = sphi %s1268_s26, %s899_s26  }
 0x165   : >> { %892 = vst [vmem:[%s1270_s26] sm:$0xff] %v891_v41  ;;  %p894_p3 = scmp.ge.s32.totalorder %s893_s3, %s1598_s22  ;;  %p884_p4 = scmp.ge.s32.totalorder %s885_s30, %s1598_s22 }
 0x167   : >> { %s1641_s3 = smov (%p894_p3, %s893_s3), 0  ;;  %887 = sbr.rel (!%p884_p4) target bundleno = 356 (0x164), region = 147 }
 0x168   : >> { %s1051_s28 = sshll.u32 %s1641_s3, 3  ;;  %s1277_s29 = smov %s1641_s3  }
 0x169   : >> { %s898_s27 = scalar_lea.vmem %s879_s24, %s1051_s28 [#allocation3]   ;;  %s899_s26 = scalar_lea.vmem %s881_s25, %s1051_s28  }
 0x16c PF: > { %s12_s13 = sadd.s32 1, %s1250_s13   ;;  %s1628_s9 = smov %s1238_s10 }
 0x16d   : > { %p9_p5 = scmp.ge.s32.totalorder %s12_s13, 4   ;;  %s1629_s10 = smov %s1346_s19 }
 0x16e   : > { %s1630_s11 = smov %s1246_s12  ;;  %s1631_s12 = smov %s1633_s15 }
 0x16f   :  { %11 = sbr.rel (!%p9_p5) target bundleno = 3 (0x3), region = 158 }

</bundles_post_ra>
